<compile_context>
chip_gen: v7x
topology: tpu7x:2x2x1
jax: 0.10.0
libtpu: 0.0.40
codegen_flags: <defaults>
</compile_context>

<pallas_src>
import jax
import jax.numpy as jnp
from jax import lax
from jax.experimental import pallas as pl
from jax.experimental.pallas import tpu as pltpu

NEG_SLOPE = 0.2  # LeakyReLU(0.2)


def _leaky_relu(x):
    return jnp.where(x >= 0, x, NEG_SLOPE * x)


def _residual_block_kernel(x_ref, top_ref, bot_ref, w1_ref, b1_ref,
                           w2_ref, b2_ref, out_ref):
    # x_ref:   (1, TH, W, C)   f32  input rows of this H-tile (NHWC)
    # top_ref: (1, 1, 2, W, C) f32  two rows above the tile (zeros at image top)
    # bot_ref: (1, 1, 2, W, C) f32  two rows below the tile (zeros at image bottom)
    # w*_ref:  (3C, 3C)        bf16 [kx*C + cin, ky*C + cout]
    # b*_ref:  (1, C)          f32
    # out_ref: (1, TH, W, C)   f32  NHWC output rows of this H-tile
    _, TH, W, C = x_ref.shape
    R1 = TH + 2                      # conv1 output rows (1-row halo for conv2)
    j = pl.program_id(1)
    last_j = pl.num_programs(1) - 1

    def conv3x3(rows_bf, w_ref, b_ref, n_out):
        # rows_bf: (n_out + 2, W, C) bf16, already zero-padded in H.
        # Returns LeakyReLU(conv3x3(rows) + b) over the n_out interior rows,
        # flattened to (n_out * W, C) f32.
        n_pad = n_out + 2
        zc = jnp.zeros((n_pad, 1, C), jnp.bfloat16)
        left = jnp.concatenate([zc, rows_bf[:, :W - 1, :]], axis=1)    # kx = 0
        right = jnp.concatenate([rows_bf[:, 1:, :], zc], axis=1)       # kx = 2
        # im2col patch, built once per conv: K index = kx*C + cin.
        patch = jnp.concatenate([left, rows_bf, right], axis=-1)       # (n_pad, W, 3C)
        patch = patch.reshape(n_pad * W, 3 * C)
        # Single bf16 MXU matmul per conv: K = 3C, N = 3C (dy stacked along N),
        # f32 accumulation.
        r = jnp.dot(patch, w_ref[...], preferred_element_type=jnp.float32)
        # Combine dy taps with row-shifted adds: out[row] = sum_ky r[row + ky, ky].
        acc = (r[0:n_out * W, 0:C]
               + r[W:(n_out + 1) * W, C:2 * C]
               + r[2 * W:(n_out + 2) * W, 2 * C:3 * C]
               + b_ref[...])
        return _leaky_relu(acc)

    x_f32 = x_ref[0]                                                   # (TH, W, C)

    # conv1 over TH + 2 rows (provides conv2's 1-row halo); H-padding comes from
    # the wrapper-provided halos (zeros beyond the image border).
    rows1 = jnp.concatenate([top_ref[0, 0], x_f32, bot_ref[0, 0]],
                            axis=0).astype(jnp.bfloat16)               # (TH+4, W, C)
    h1 = conv3x3(rows1, w1_ref, b1_ref, R1).reshape(R1, W, C)

    # Halo rows of h1 that fall outside the image are conv2's zero padding, not
    # conv1 outputs (bias + LeakyReLU would make them nonzero): zero them at the
    # image borders.  Only two rows are touched; correct for any core sharding.
    top_keep = (j > 0).astype(jnp.float32)
    bot_keep = (j < last_j).astype(jnp.float32)
    h1 = jnp.concatenate([h1[0:1] * top_keep,
                          h1[1:R1 - 1],
                          h1[R1 - 1:R1] * bot_keep], axis=0)

    # conv2 over the TH output rows.
    h2 = conv3x3(h1.astype(jnp.bfloat16), w2_ref, b2_ref, TH)

    # Residual add in f32, straight from the unpadded input block.
    out_ref[0] = (h2.reshape(TH, W, C) + x_f32).astype(out_ref.dtype)


def _prep_weight(w):
    """OIHW (cout, cin, ky, kx) -> (kx*C + cin, ky*C + cout), bf16 (192, 192)."""
    cout, cin, kh, kw = w.shape
    return (jnp.transpose(w, (3, 1, 2, 0))
            .reshape(kw * cin, kh * cout)
            .astype(jnp.bfloat16))


def _select_tile_h(B, H, W, max_tile_elems=8192):
    """Largest H-tile (multiple of 8 dividing H, or H itself) with TH*W bounded,
    keeping at least two grid steps overall so both v7x TensorCores get work."""
    cands = [d for d in range(8, H + 1, 8) if H % d == 0] or [H]
    fits = [d for d in cands if d * W <= max_tile_elems] or [min(cands)]
    th = max(fits)
    if B * (H // th) < 2:
        multi = [d for d in fits if H // d >= 2]
        if multi:
            th = max(multi)
    return th


def residual_block_nhwc(x, w1, b1, w2, b2):
    """_Residual_Block forward in NHWC (preferred layout: keeps the activation
    NHWC end-to-end when chaining blocks).  x: (B, H, W, 64) float32."""
    B, H, W, C = x.shape
    assert C == 64, "_Residual_Block is defined for 64 channels"
    assert H >= 2, "kernel needs at least 2 image rows"

    TH = _select_tile_h(B, H, W)
    nT = H // TH
    assert H % TH == 0 and TH >= 2

    x = x.astype(jnp.float32)
    # 2-row halos above/below each H-tile (zeros beyond the image border).
    xt = x.reshape(B, nT, TH, W, C)
    z2 = jnp.zeros((B, 1, 2, W, C), jnp.float32)
    top = jnp.concatenate([z2, xt[:, :-1, TH - 2:TH]], axis=1)          # (B,nT,2,W,C)
    bot = jnp.concatenate([xt[:, 1:, 0:2], z2], axis=1)                 # (B,nT,2,W,C)

    w1s = _prep_weight(w1)
    w2s = _prep_weight(w2)
    b1r = b1.reshape(1, C).astype(jnp.float32)
    b2r = b2.reshape(1, C).astype(jnp.float32)

    # Scoped-VMEM request sized from the tile footprint (double-buffered in/out
    # blocks + bf16 patch / f32 matmul-result temporaries), clamped so v7x's
    # 64 MiB physical VMEM keeps headroom and v5e's 16 MiB default is raised.
    tile_bytes = TH * W * C * 4
    vmem_limit = int(min(max(12 * tile_bytes + (16 << 20), 32 << 20), 44 << 20))

    return pl.pallas_call(
        _residual_block_kernel,
        out_shape=jax.ShapeDtypeStruct((B, H, W, C), jnp.float32),
        grid=(B, nT),
        in_specs=[
            pl.BlockSpec((1, TH, W, C), lambda b, j: (b, j, 0, 0)),
            pl.BlockSpec((1, 1, 2, W, C), lambda b, j: (b, j, 0, 0, 0)),
            pl.BlockSpec((1, 1, 2, W, C), lambda b, j: (b, j, 0, 0, 0)),
            pl.BlockSpec((3 * C, 3 * C), lambda b, j: (0, 0)),
            pl.BlockSpec((1, C), lambda b, j: (0, 0)),
            pl.BlockSpec((3 * C, 3 * C), lambda b, j: (0, 0)),
            pl.BlockSpec((1, C), lambda b, j: (0, 0)),
        ],
        out_specs=pl.BlockSpec((1, TH, W, C), lambda b, j: (b, j, 0, 0)),
        compiler_params=pltpu.CompilerParams(
            dimension_semantics=("parallel", "parallel"),
            vmem_limit_bytes=vmem_limit),
    )(x, top, bot, w1s, b1r, w2s, b2r)


@jax.jit
def residual_block(x_nchw, w1, b1, w2, b2):
    """PyTorch-interface wrapper: NCHW in, NCHW out.  The two transposes are the
    layout cost of matching the PyTorch API; chained blocks should call
    residual_block_nhwc directly and stay NHWC end-to-end."""
    x = jnp.transpose(x_nchw, (0, 2, 3, 1))
    y = residual_block_nhwc(x, w1, b1, w2, b2)
    return jnp.transpose(y, (0, 3, 1, 2))


def _reference(x_nchw, w1, b1, w2, b2):
    """Pure-JAX f32 reference using lax.conv_general_dilated (NCHW/OIHW)."""
    dn = ("NCHW", "OIHW", "NCHW")

    def conv(v, w, b):
        y = lax.conv_general_dilated(v, w, window_strides=(1, 1),
                                     padding=((1, 1), (1, 1)),
                                     dimension_numbers=dn,
                                     precision=lax.Precision.HIGHEST)
        return y + b.reshape(1, -1, 1, 1)

    h = _leaky_relu(conv(x_nchw, w1, b1))
    h = _leaky_relu(conv(h, w2, b2))
    return h + x_nchw


if __name__ == "__main__":
    key = jax.random.PRNGKey(0)
    kx, kw1, kb1, kw2, kb2 = jax.random.split(key, 5)

    B, C, H, W = 2, 64, 16, 16  # channels fixed at 64 by the module
    x = jax.random.normal(kx, (B, C, H, W), jnp.float32)

    # Deterministic synthetic parameters (shapes of nn.Conv2d(64, 64, 3)).
    w1 = 0.05 * jax.random.normal(kw1, (C, C, 3, 3), jnp.float32)
    b1 = 0.01 * jax.random.normal(kb1, (C,), jnp.float32)
    w2 = 0.05 * jax.random.normal(kw2, (C, C, 3, 3), jnp.float32)
    b2 = 0.01 * jax.random.normal(kb2, (C,), jnp.float32)

    out = jax.block_until_ready(residual_block(x, w1, b1, w2, b2))
    ref = _reference(x, w1, b1, w2, b2)
    assert out.shape == (B, C, H, W)
    # bf16 MXU operands (f32 accumulation) -> looser tolerance vs. f32 reference.
    assert jnp.allclose(out, ref, atol=1e-1, rtol=5e-2), "mismatch vs reference"

    # Second shape exercises the multi-tile halo path (B=1 forces nT >= 2).
    x2 = jax.random.normal(kx, (1, C, 24, 8), jnp.float32)
    out2 = jax.block_until_ready(residual_block(x2, w1, b1, w2, b2))
    ref2 = _reference(x2, w1, b1, w2, b2)
    assert out2.shape == (1, C, 24, 8)
    assert jnp.allclose(out2, ref2, atol=1e-1, rtol=5e-2), "mismatch (multi-tile)"

    print("KERNEL_OK")
</pallas_src>

<mosaic_0001>
module attributes {stable_mosaic.version = 11 : i64} {
  func.func @_residual_block_kernel(%arg0: i32, %arg1: i32, %arg2: memref<1x16x16x64xf32, #tpu.memory_space<vmem>>, %arg3: memref<1x1x2x16x64xf32, #tpu.memory_space<vmem>>, %arg4: memref<1x1x2x16x64xf32, #tpu.memory_space<vmem>>, %arg5: memref<192x192xbf16, #tpu.memory_space<vmem>>, %arg6: memref<1x64xf32, #tpu.memory_space<vmem>>, %arg7: memref<192x192xbf16, #tpu.memory_space<vmem>>, %arg8: memref<1x64xf32, #tpu.memory_space<vmem>>, %arg9: memref<1x16x16x64xf32, #tpu.memory_space<vmem>>) attributes {dimension_semantics = [#tpu.dimension_semantics<parallel>, #tpu.dimension_semantics<parallel>], iteration_bounds = array<i64: 2, 1>, scalar_prefetch = 0 : i64, scratch_operands = 0 : i64, tpu.core_type = #tpu.core_type<tc>, window_params = [{transform_indices = @transform_0, window_bounds = array<i64: 1, 16, 16, 64>}, {transform_indices = @transform_1, window_bounds = array<i64: 1, 1, 2, 16, 64>}, {transform_indices = @transform_2, window_bounds = array<i64: 1, 1, 2, 16, 64>}, {pipeline_mode = #tpu.pipeline_mode<synchronous>, transform_indices = @transform_3, window_bounds = array<i64: 192, 192>}, {pipeline_mode = #tpu.pipeline_mode<synchronous>, transform_indices = @transform_4, window_bounds = array<i64: 1, 64>}, {pipeline_mode = #tpu.pipeline_mode<synchronous>, transform_indices = @transform_5, window_bounds = array<i64: 192, 192>}, {pipeline_mode = #tpu.pipeline_mode<synchronous>, transform_indices = @transform_6, window_bounds = array<i64: 1, 64>}, {transform_indices = @transform_7, window_bounds = array<i64: 1, 16, 16, 64>}]} {
    %c0 = arith.constant 0 : index
    %c0_0 = arith.constant 0 : index
    %c0_1 = arith.constant 0 : index
    %c0_2 = arith.constant 0 : index
    %0 = vector.load %arg2[%c0, %c0_0, %c0_1, %c0_2] : memref<1x16x16x64xf32, #tpu.memory_space<vmem>>, vector<1x16x16x64xf32>
    %1 = vector.shape_cast %0 : vector<1x16x16x64xf32> to vector<16x16x64xf32>
    %c0_3 = arith.constant 0 : index
    %c0_4 = arith.constant 0 : index
    %c0_5 = arith.constant 0 : index
    %c0_6 = arith.constant 0 : index
    %c0_7 = arith.constant 0 : index
    %2 = vector.load %arg3[%c0_3, %c0_4, %c0_5, %c0_6, %c0_7] : memref<1x1x2x16x64xf32, #tpu.memory_space<vmem>>, vector<1x1x2x16x64xf32>
    %3 = vector.shape_cast %2 : vector<1x1x2x16x64xf32> to vector<2x16x64xf32>
    %c0_8 = arith.constant 0 : index
    %c0_9 = arith.constant 0 : index
    %c0_10 = arith.constant 0 : index
    %c0_11 = arith.constant 0 : index
    %c0_12 = arith.constant 0 : index
    %4 = vector.load %arg4[%c0_8, %c0_9, %c0_10, %c0_11, %c0_12] : memref<1x1x2x16x64xf32, #tpu.memory_space<vmem>>, vector<1x1x2x16x64xf32>
    %5 = vector.shape_cast %4 : vector<1x1x2x16x64xf32> to vector<2x16x64xf32>
    %6 = tpu.concatenate %3, %1, %5 in 0 : vector<2x16x64xf32>, vector<16x16x64xf32>, vector<2x16x64xf32> -> vector<20x16x64xf32>
    %7 = arith.truncf %6 : vector<20x16x64xf32> to vector<20x16x64xbf16>
    %cst = arith.constant 0.000000e+00 : bf16
    %8 = vector.broadcast %cst : bf16 to vector<20x1x64xbf16>
    %9 = vector.extract_strided_slice %7 {offsets = [0, 0, 0], sizes = [20, 15, 64], strides = [1, 1, 1]} : vector<20x16x64xbf16> to vector<20x15x64xbf16>
    %10 = tpu.concatenate %8, %9 in 1 : vector<20x1x64xbf16>, vector<20x15x64xbf16> -> vector<20x16x64xbf16>
    %11 = vector.extract_strided_slice %7 {offsets = [0, 1, 0], sizes = [20, 15, 64], strides = [1, 1, 1]} : vector<20x16x64xbf16> to vector<20x15x64xbf16>
    %12 = tpu.concatenate %11, %8 in 1 : vector<20x15x64xbf16>, vector<20x1x64xbf16> -> vector<20x16x64xbf16>
    %13 = tpu.concatenate %10, %7, %12 in 2 : vector<20x16x64xbf16>, vector<20x16x64xbf16>, vector<20x16x64xbf16> -> vector<20x16x192xbf16>
    %14 = vector.shape_cast %13 : vector<20x16x192xbf16> to vector<320x192xbf16>
    %c0_13 = arith.constant 0 : index
    %c0_14 = arith.constant 0 : index
    %15 = vector.load %arg5[%c0_13, %c0_14] : memref<192x192xbf16, #tpu.memory_space<vmem>>, vector<192x192xbf16>
    %cst_15 = arith.constant dense<0.000000e+00> : vector<320x192xf32>
    %16 = tpu.matmul %14, %15, %cst_15 {dimension_numbers = #tpu.dot_dimension_numbers<[1], [0], [0], [1], [0, 0, 1, 1], [], []>} : vector<320x192xbf16>, vector<192x192xbf16>, vector<320x192xf32> -> vector<320x192xf32>
    %17 = vector.extract_strided_slice %16 {offsets = [0, 0], sizes = [288, 64], strides = [1, 1]} : vector<320x192xf32> to vector<288x64xf32>
    %18 = vector.extract_strided_slice %16 {offsets = [16, 64], sizes = [288, 64], strides = [1, 1]} : vector<320x192xf32> to vector<288x64xf32>
    %19 = arith.addf %17, %18 : vector<288x64xf32>
    %20 = vector.extract_strided_slice %16 {offsets = [32, 128], sizes = [288, 64], strides = [1, 1]} : vector<320x192xf32> to vector<288x64xf32>
    %21 = arith.addf %19, %20 : vector<288x64xf32>
    %c0_16 = arith.constant 0 : index
    %c0_17 = arith.constant 0 : index
    %22 = vector.load %arg6[%c0_16, %c0_17] : memref<1x64xf32, #tpu.memory_space<vmem>>, vector<1x64xf32>
    %23 = vector.broadcast %22 : vector<1x64xf32> to vector<288x64xf32>
    %24 = arith.addf %21, %23 : vector<288x64xf32>
    %cst_18 = arith.constant 0.000000e+00 : f32
    %25 = vector.broadcast %cst_18 : f32 to vector<288x64xf32>
    %26 = arith.cmpf oge, %24, %25 : vector<288x64xf32>
    %cst_19 = arith.constant 2.000000e-01 : f32
    %27 = vector.broadcast %cst_19 : f32 to vector<288x64xf32>
    %28 = arith.mulf %27, %24 : vector<288x64xf32>
    %29 = arith.select %26, %24, %28 : vector<288x64xi1>, vector<288x64xf32>
    %30 = vector.shape_cast %29 : vector<288x64xf32> to vector<18x16x64xf32>
    %c0_i32 = arith.constant 0 : i32
    %31 = arith.cmpi sgt, %arg1, %c0_i32 : i32
    %32 = arith.extui %31 : i1 to i32
    %33 = arith.sitofp %32 : i32 to f32
    %c0_i32_20 = arith.constant 0 : i32
    %34 = arith.cmpi slt, %arg1, %c0_i32_20 : i32
    %35 = arith.extui %34 : i1 to i32
    %36 = arith.sitofp %35 : i32 to f32
    %37 = vector.extract_strided_slice %30 {offsets = [0, 0, 0], sizes = [1, 16, 64], strides = [1, 1, 1]} : vector<18x16x64xf32> to vector<1x16x64xf32>
    %38 = vector.broadcast %33 : f32 to vector<1x16x64xf32>
    %39 = arith.mulf %37, %38 : vector<1x16x64xf32>
    %40 = vector.extract_strided_slice %30 {offsets = [1, 0, 0], sizes = [16, 16, 64], strides = [1, 1, 1]} : vector<18x16x64xf32> to vector<16x16x64xf32>
    %41 = vector.extract_strided_slice %30 {offsets = [17, 0, 0], sizes = [1, 16, 64], strides = [1, 1, 1]} : vector<18x16x64xf32> to vector<1x16x64xf32>
    %42 = vector.broadcast %36 : f32 to vector<1x16x64xf32>
    %43 = arith.mulf %41, %42 : vector<1x16x64xf32>
    %44 = tpu.concatenate %39, %40, %43 in 0 : vector<1x16x64xf32>, vector<16x16x64xf32>, vector<1x16x64xf32> -> vector<18x16x64xf32>
    %45 = arith.truncf %44 : vector<18x16x64xf32> to vector<18x16x64xbf16>
    %cst_21 = arith.constant 0.000000e+00 : bf16
    %46 = vector.broadcast %cst_21 : bf16 to vector<18x1x64xbf16>
    %47 = vector.extract_strided_slice %45 {offsets = [0, 0, 0], sizes = [18, 15, 64], strides = [1, 1, 1]} : vector<18x16x64xbf16> to vector<18x15x64xbf16>
    %48 = tpu.concatenate %46, %47 in 1 : vector<18x1x64xbf16>, vector<18x15x64xbf16> -> vector<18x16x64xbf16>
    %49 = vector.extract_strided_slice %45 {offsets = [0, 1, 0], sizes = [18, 15, 64], strides = [1, 1, 1]} : vector<18x16x64xbf16> to vector<18x15x64xbf16>
    %50 = tpu.concatenate %49, %46 in 1 : vector<18x15x64xbf16>, vector<18x1x64xbf16> -> vector<18x16x64xbf16>
    %51 = tpu.concatenate %48, %45, %50 in 2 : vector<18x16x64xbf16>, vector<18x16x64xbf16>, vector<18x16x64xbf16> -> vector<18x16x192xbf16>
    %52 = vector.shape_cast %51 : vector<18x16x192xbf16> to vector<288x192xbf16>
    %c0_22 = arith.constant 0 : index
    %c0_23 = arith.constant 0 : index
    %53 = vector.load %arg7[%c0_22, %c0_23] : memref<192x192xbf16, #tpu.memory_space<vmem>>, vector<192x192xbf16>
    %cst_24 = arith.constant dense<0.000000e+00> : vector<288x192xf32>
    %54 = tpu.matmul %52, %53, %cst_24 {dimension_numbers = #tpu.dot_dimension_numbers<[1], [0], [0], [1], [0, 0, 1, 1], [], []>} : vector<288x192xbf16>, vector<192x192xbf16>, vector<288x192xf32> -> vector<288x192xf32>
    %55 = vector.extract_strided_slice %54 {offsets = [0, 0], sizes = [256, 64], strides = [1, 1]} : vector<288x192xf32> to vector<256x64xf32>
    %56 = vector.extract_strided_slice %54 {offsets = [16, 64], sizes = [256, 64], strides = [1, 1]} : vector<288x192xf32> to vector<256x64xf32>
    %57 = arith.addf %55, %56 : vector<256x64xf32>
    %58 = vector.extract_strided_slice %54 {offsets = [32, 128], sizes = [256, 64], strides = [1, 1]} : vector<288x192xf32> to vector<256x64xf32>
    %59 = arith.addf %57, %58 : vector<256x64xf32>
    %c0_25 = arith.constant 0 : index
    %c0_26 = arith.constant 0 : index
    %60 = vector.load %arg8[%c0_25, %c0_26] : memref<1x64xf32, #tpu.memory_space<vmem>>, vector<1x64xf32>
    %61 = vector.broadcast %60 : vector<1x64xf32> to vector<256x64xf32>
    %62 = arith.addf %59, %61 : vector<256x64xf32>
    %cst_27 = arith.constant 0.000000e+00 : f32
    %63 = vector.broadcast %cst_27 : f32 to vector<256x64xf32>
    %64 = arith.cmpf oge, %62, %63 : vector<256x64xf32>
    %cst_28 = arith.constant 2.000000e-01 : f32
    %65 = vector.broadcast %cst_28 : f32 to vector<256x64xf32>
    %66 = arith.mulf %65, %62 : vector<256x64xf32>
    %67 = arith.select %64, %62, %66 : vector<256x64xi1>, vector<256x64xf32>
    %68 = vector.shape_cast %67 : vector<256x64xf32> to vector<16x16x64xf32>
    %69 = arith.addf %68, %1 : vector<16x16x64xf32>
    %c0_29 = arith.constant 0 : index
    %c0_30 = arith.constant 0 : index
    %c0_31 = arith.constant 0 : index
    %c0_32 = arith.constant 0 : index
    %70 = vector.load %arg9[%c0_29, %c0_30, %c0_31, %c0_32] : memref<1x16x16x64xf32, #tpu.memory_space<vmem>>, vector<1x16x16x64xf32>
    %71 = vector.shape_cast %70 : vector<1x16x16x64xf32> to vector<16x16x64xf32>
    %72 = vector.shape_cast %69 : vector<16x16x64xf32> to vector<1x16x16x64xf32>
    tpu.vector_store %arg9[%c0_29, %c0_30, %c0_31, %c0_32], %72 {strides = array<i32>} : memref<1x16x16x64xf32, #tpu.memory_space<vmem>>, vector<1x16x16x64xf32>,
    return
  }
  func.func @transform_0(%arg0: i32, %arg1: i32) -> (i32, i32, i32, i32) {
    %c0_i32 = arith.constant 0 : i32
    %c0_i32_0 = arith.constant 0 : i32
    %c0_i32_1 = arith.constant 0 : i32
    return %arg0, %arg1, %c0_i32, %c0_i32_0 : i32, i32, i32, i32
  }
  func.func @transform_1(%arg0: i32, %arg1: i32) -> (i32, i32, i32, i32, i32) {
    %c0_i32 = arith.constant 0 : i32
    %c0_i32_0 = arith.constant 0 : i32
    %c0_i32_1 = arith.constant 0 : i32
    %c0_i32_2 = arith.constant 0 : i32
    return %arg0, %arg1, %c0_i32, %c0_i32_0, %c0_i32_1 : i32, i32, i32, i32, i32
  }
  func.func @transform_2(%arg0: i32, %arg1: i32) -> (i32, i32, i32, i32, i32) {
    %c0_i32 = arith.constant 0 : i32
    %c0_i32_0 = arith.constant 0 : i32
    %c0_i32_1 = arith.constant 0 : i32
    %c0_i32_2 = arith.constant 0 : i32
    return %arg0, %arg1, %c0_i32, %c0_i32_0, %c0_i32_1 : i32, i32, i32, i32, i32
  }
  func.func @transform_3(%arg0: i32, %arg1: i32) -> (i32, i32) {
    %c0_i32 = arith.constant 0 : i32
    %c0_i32_0 = arith.constant 0 : i32
    %c0_i32_1 = arith.constant 0 : i32
    return %c0_i32, %c0_i32_0 : i32, i32
  }
  func.func @transform_4(%arg0: i32, %arg1: i32) -> (i32, i32) {
    %c0_i32 = arith.constant 0 : i32
    %c0_i32_0 = arith.constant 0 : i32
    %c0_i32_1 = arith.constant 0 : i32
    return %c0_i32, %c0_i32_0 : i32, i32
  }
  func.func @transform_5(%arg0: i32, %arg1: i32) -> (i32, i32) {
    %c0_i32 = arith.constant 0 : i32
    %c0_i32_0 = arith.constant 0 : i32
    %c0_i32_1 = arith.constant 0 : i32
    return %c0_i32, %c0_i32_0 : i32, i32
  }
  func.func @transform_6(%arg0: i32, %arg1: i32) -> (i32, i32) {
    %c0_i32 = arith.constant 0 : i32
    %c0_i32_0 = arith.constant 0 : i32
    %c0_i32_1 = arith.constant 0 : i32
    return %c0_i32, %c0_i32_0 : i32, i32
  }
  func.func @transform_7(%arg0: i32, %arg1: i32) -> (i32, i32, i32, i32) {
    %c0_i32 = arith.constant 0 : i32
    %c0_i32_0 = arith.constant 0 : i32
    %c0_i32_1 = arith.constant 0 : i32
    return %arg0, %arg1, %c0_i32, %c0_i32_0 : i32, i32, i32, i32
  }
}

</mosaic_0001>

<bundles_post_ra>
// kernel: residual_block.1
= control target key start
LH: loop header
LB: loop body
LE: loop exit
PB: predicated region body
PF: predicated region fallthrough
CT: control target
= control target key end

     0   :  { %12 = vsyncpa [#allocation3], 0  ;;  %s4856_s0 = inlined_call_operand.vmem [shape: f32[2,16,16,64], index: 0, kind: input, shape index: {}]   ;;  %s4857_s1 = inlined_call_operand.vmem [shape: f32[2,1,2,16,64], index: 1, kind: input, shape index: {}, may-alias: {1,2}]   ;;  %s4858_s2 = inlined_call_operand.vmem [shape: f32[2,1,2,16,64], index: 2, kind: input, shape index: {}, may-alias: {1,2}]   ;;  %s4859_s3 = inlined_call_operand.vmem [shape: bf16[192,192], index: 3, kind: input, shape index: {}]   ;;  %s4860_s4 = inlined_call_operand.vmem [shape: f32[1,64], index: 4, kind: input, shape index: {}]   ;;  %s4861_s5 = inlined_call_operand.vmem [shape: bf16[192,192], index: 5, kind: input, shape index: {}]   ;;  %s4862_s6 = inlined_call_operand.vmem [shape: f32[1,64], index: 6, kind: input, shape index: {}]   ;;  %s4863_s7 = inlined_call_operand.hbm [shape: f32[2,16,16,64], index: 7, kind: output, shape index: {}]  }
   0x1   :  { %14 = vsyncpa [#allocation3 + $0x1], 0  ;;  %s3367_s24 = smov 0   ;;  %s3369_s25 = smov 0  }
   0x2   :  { %s3371_s26 = smov 0   ;;  %s3373_s27 = smov 0  }
   0x3   :  { %s3375_s28 = smov 0   ;;  %s3377_s29 = smov 0  }
   0x4 LB: > { %s2972_s30 = sadd.s32 4294967295, %s3321_s29   ;;  %s2973_s8 = sadd.s32 4294967294, %s3321_s29   ;;  %s3321_s29 = sphi %s3377_s29, %s20_s29   ;;  %s3317_s28 = sphi %s3375_s28, %s4916_s28   ;;  %s3313_s27 = sphi %s3373_s27, %s4915_s27   ;;  %s3309_s26 = sphi %s3371_s26, %s4914_s26   ;;  %s3305_s25 = sphi %s3369_s25, %s4913_s25   ;;  %s3301_s24 = sphi %s3367_s24, %s4912_s24  }
   0x5   : > { %s32_s9 = sadd.s32 1, %s3317_s28  ;;  %s209_s10 = sadd.s32 1, %s3309_s26 }
   0x6   : > { %p34_p0 = scmp.ge.s32.totalorder %s32_s9, 2  ;;  %p219_p1 = scmp.ne.s32.totalorder %s3309_s26, %s3305_s25 }
   0x7   : > { %p220_p2 = scmp.eq.s32.totalorder %s2972_s30, 1  ;;  %p225_p3 = scmp.ne.s32.totalorder %s3305_s25, %s3301_s24 }
   0x8   : > { %s4918_s9 = smov (%p34_p0, %s32_s9), 0  ;;  %p226_p5 = scmp.eq.s32.totalorder %s2973_s8, 1 }
   0x9   : > { %4870 = sst [smem:[#allocation5_spill]] %s4918_s9  ;;  %p3407_p4 = por %p220_p2, %p219_p1 }
   0xa   : > { %s204_s12 = ssub.s32 %s3317_s28, %s4918_s9  ;;  %p2976_p6 = scmp.ge.s32.totalorder %s3321_s29, 1 }
   0xb   : > { %p207_p7 = scmp.eq.s32.totalorder %s204_s12, 0  ;;  %p3414_p8 = por %p226_p5, %p225_p3 }
   0xc   : > { %p294_p9 = scmp.lt.s32.totalorder %s3321_s29, 3 }
   0xd   : > { %s3420_s14 = scalar_select %p207_p7, %s3309_s26, %s209_s10  }
   0xe   : > { %p295_p10 = pnand %p2976_p6, %p294_p9 }
  0x10   : > { %298 = sbr.rel (%p295_p10) target bundleno = 1155 (0x483), region = 48 }
  0x17   : > { %p350_p11 = scmp.lt.s32.totalorder %s3313_s27, 1  ;;  %v3139_v0 = vld [vmem:[%s4859_s3 + $0x4] ss:$8 sps:$4 sm:$0xff]   ;;  %v3141_v1 = vld [vmem:[%s4859_s3] ss:$8 sps:$4 sm:$0xff]   ;;  %vm683_vm0 = vcmask 1047552  }
  0x18   : > { %1051 = vmatprep.subr.bf16.mxu0 %v3139_v0  ;;  %v3142_v2 = vld [vmem:[%s4859_s3 + $0x14] ss:$8 sps:$4 sm:$0xff]   ;;  %v3144_v3 = vld [vmem:[%s4859_s3 + $0x10] ss:$8 sps:$4 sm:$0xff]   ;;  %v3145_v4 = vld [vmem:[%s4859_s3 + $0x24] ss:$8 sps:$4 sm:$0xff]  }
  0x19   : > { %s3430_s19 = scalar_select %p350_p11, %s3313_s27, 1  ;;  %1052 = vmatpush1.bf16.msra.mxu0 %v3141_v1  ;;  %v3147_v5 = vld [vmem:[%s4859_s3 + $0x20] ss:$8 sps:$4 sm:$0xff]   ;;  %v3148_v16 = vld [vmem:[%s4859_s3 + $0x34] ss:$8 sps:$4 sm:$0xff]   ;;  %vm766_vm2 = vcmask 523264  }
  0x1a   : > { %1053 = vmatprep.subr.bf16.mxu0 %v3142_v2  ;;  %v3150_v24 = vld [vmem:[%s4859_s3 + $0x30] ss:$8 sps:$4 sm:$0xff]   ;;  %v3151_v31 = vld [vmem:[%s4859_s3 + $0x44] ss:$8 sps:$4 sm:$0xff]   ;;  %v3153_v35 = vld [vmem:[%s4859_s3 + $0x40] ss:$8 sps:$4 sm:$0xff]  }
  0x1b   : > { %s3078_s30 = sshll.u32 %s3430_s19, 5  ;;  %s3077_s8 = sshll.u32 %s3430_s19, 8  ;;  %v3154_v37 = vld [vmem:[%s4859_s3 + $0x54] ss:$8 sps:$4 sm:$0xff]   ;;  %v3156_v44 = vld [vmem:[%s4859_s3 + $0x50] ss:$8 sps:$4 sm:$0xff]  }
  0x1c   : > { %s368_s17 = scalar_lea.vmem %s4857_s1, %s3078_s30  ;;  %s3451_s21 = scalar_lea.vmem %s4856_s0, %s3077_s8  ;;  %v3157_v45 = vld [vmem:[%s4859_s3 + $0x64] ss:$8 sps:$4 sm:$0xff]   ;;  %vm684_vm1 = vsmask.f32 7424  ;;  %v3159_v51 = vld [vmem:[%s4859_s3 + $0x60] ss:$8 sps:$4 sm:$0xff]  }
  0x1d   : > { %v412_v6 = vld [vmem:[%s368_s17] sm:$0xff]  ;;  %v413_v7 = vld [vmem:[%s368_s17 + $0x8] sm:$0xff]  ;;  %v414_v8 = vld [vmem:[%s368_s17 + $0x10] sm:$0xff]  ;;  %1054 = vmatpush1.bf16.msra.mxu0 %v3144_v3  ;;  %s3323_s8 = smov 64   ;;  %vm600_vm4 = vcmask 1040384   ;;  %s3639_s20 = scalar_lea.vmem %s4858_s2, %s3078_s30 }
  0x1e   : > { %v420_v9 = vpack.c.bf16 %v413_v7, %v412_v6  ;;  %v415_v10 = vld [vmem:[%s368_s17 + $0x18] sm:$0xff]  ;;  %v380_v11 = vld [vmem:[%s3451_s21] sm:$0xff]  ;;  %v381_v12 = vld [vmem:[%s3451_s21 + $0x8] sm:$0xff]  ;;  %1055 = vmatprep.subr.bf16.mxu0 %v3145_v4  ;;  %vm601_vm5 = vsmask.f32 256  ;;  %s346_s23 = sand.u32 1, %s3305_s25  }
  0x1f   : > { %v3458_v13 = vpack.c.bf16 %v381_v12, %v380_v11  ;;  %v382_v14 = vld [vmem:[%s3451_s21 + $0x10] sm:$0xff]  ;;  %v383_v15 = vld [vmem:[%s3451_s21 + $0x18] sm:$0xff]  ;;  %v3466_v17 = vpack.c.bf16 %v415_v10, %v414_v8  ;;  %v384_v20 = vld [vmem:[%s3451_s21 + $0x20] sm:$0xff]  ;;  %s2977_s10 = sshll.u32 %s346_s23, 8  ;;  %s3324_s19 = smov [#allocation2]  }
  0x20   : > { %726 = vrot.lane.b32.xlu0 %v420_v9, %s3323_s8  ;;  %v441_v18 = vshrl.u32 %v420_v9, 16  ;;  %v3470_v19 = vpack.c.bf16 %v383_v15, %v382_v14  ;;  %v385_v21 = vld [vmem:[%s3451_s21 + $0x28] sm:$0xff]  ;;  %v386_v22 = vld [vmem:[%s3451_s21 + $0x30] sm:$0xff]  ;;  %v387_v23 = vld [vmem:[%s3451_s21 + $0x38] sm:$0xff]  ;;  %v444_v26 = vshll.u32 %v420_v9, 16  ;;  %s4539_s12 = scalar_lea.vmem [#allocation2], %s2977_s10 }
  0x21   : > { %730 = vrot.lane.b32.xlu1 %v3458_v13, %s3323_s8  ;;  %1056 = vmatpush1.bf16.msra.mxu0 %v3147_v5  ;;  %v388_v27 = vld [vmem:[%s3451_s21 + $0x40] sm:$0xff]  ;;  %v3482_v28 = vpack.c.bf16 %v385_v21, %v384_v20  ;;  %v389_v29 = vld [vmem:[%s3451_s21 + $0x48] sm:$0xff]  ;;  %v390_v30 = vld [vmem:[%s3451_s21 + $0x50] sm:$0xff]  ;;  %v3493_v33 = vpack.c.bf16 %v387_v23, %v386_v22  ;;  %s2848_s15 = sshll.u32 %s4539_s12, 4  ;;  %s3247_s30 = sshll.u32 %s3324_s19, 4  ;;  %s4801_s15 = int_to_ptr.vmem [resolvable:$true] %s2848_s15  ;;  %s3248_s30 = int_to_ptr.vmem [resolvable:$false] %s3247_s30 }
  0x22   : > { %v443_v25 = vrot.slane %v441_v18, 7  ;;  %1057 = vmatprep.subr.bf16.mxu0 %v3148_v16  ;;  %v391_v34 = vld [vmem:[%s3451_s21 + $0x58] sm:$0xff]  ;;  %v392_v36 = vld [vmem:[%s3451_s21 + $0x60] sm:$0xff]  ;;  %v623_v38 = vrot.slane %v444_v26, 1  ;;  %v3505_v39 = vpack.c.bf16 %v389_v29, %v388_v27  ;;  %v393_v40 = vld [vmem:[%s3451_s21 + $0x68] sm:$0xff]  ;;  %v4875_v29 = vmov 0  ;;  %p3250_p1 = scmp.lt.s32.totalorder %s4801_s15, %s3248_s30 }
  0x23   : > { %v394_v41 = vld [vmem:[%s3451_s21 + $0x70] sm:$0xff]  ;;  %v3511_v42 = vpack.c.bf16 %v391_v34, %v390_v30  ;;  %v395_v43 = vld [vmem:[%s3451_s21 + $0x78] sm:$0xff]  ;;  %v3522_v47 = vpack.c.bf16 %v393_v40, %v392_v36  ;;  %v396_v48 = vld [vmem:[%s3451_s21 + $0x80] sm:$0xff]  ;;  %v458_v30 = vshll.u32 %v3458_v13, 16  ;;  %s3249_s22 = scalar_lea.vmem %s3248_s30, 8192 }
  0x24   : > { %728 = vrot.lane.b32.xlu0 %v3466_v17, %s3323_s8  ;;  %v3489_v32 = vor.u32 %v444_v26, %v443_v25  ;;  %v624_v46 = vor.u32 %v623_v38, %v441_v18  ;;  %v3527_v49 = vpack.c.bf16 %v395_v43, %v394_v41  ;;  %v397_v50 = vld [vmem:[%s3451_s21 + $0x88] sm:$0xff]  ;;  %vm3533_vm3 = vmand %vm683_vm0, %vm684_vm1  ;;  %v398_v53 = vld [vmem:[%s3451_s21 + $0x90] sm:$0xff]  ;;  %v451_v25 = vshll.u32 %v3466_v17, 16 }
  0x25   : > { %732 = vrot.lane.b32.xlu1 %v3470_v19, %s3323_s8  ;;  %1058 = vmatpush1.bf16.msra.mxu0 %v3150_v24  ;;  %v3160_v54 = vld [vmem:[%s4859_s3 + $0x74] ss:$8 sps:$4 sm:$0xff]   ;;  %v3546_v57 = vpack.c.bf16 %v397_v50, %v396_v48  ;;  %v3162_v58 = vld [vmem:[%s4859_s3 + $0x70] ss:$8 sps:$4 sm:$0xff]   ;;  %v3163_v59 = vld [vmem:[%s4859_s3 + $0x84] ss:$8 sps:$4 sm:$0xff]  }
  0x26   : > { %1059 = vmatprep.subr.bf16.mxu0 %v3151_v31  ;;  %v686_v55 = vsel %vm3533_vm3, %v624_v46, 0  ;;  %v399_v56 = vld [vmem:[%s3451_s21 + $0x98] sm:$0xff]  ;;  %v3165_v61 = vld [vmem:[%s4859_s3 + $0x80] ss:$8 sps:$4 sm:$0xff]   ;;  %v3169_v3 = vld [vmem:[%s4859_s3 + $0xa4] ss:$8 sps:$4 sm:$0xff]  }
  0x27   : > { %3008 = vmatprep.mubr.msk.bf16.mxu0 %vm766_vm2, %v686_v55  ;;  %v3557_v60 = vpack.c.bf16 %v399_v56, %v398_v53  ;;  %v400_v62 = vld [vmem:[%s3451_s21 + $0xa0] sm:$0xff]  ;;  %v401_v63 = vld [vmem:[%s3451_s21 + $0xa8] sm:$0xff]  ;;  %v3166_v0 = vld [vmem:[%s4859_s3 + $0x94] ss:$8 sps:$4 sm:$0xff]   ;;  %v448_v26 = vshrl.u32 %v3466_v17, 16  ;;  %v625_v27 = vrot.slane %v451_v25, 1 }
  0x28   : > { %734 = vrot.lane.b32.xlu0 %v3482_v28, %s3323_s8  ;;  %v3571_v1 = vpack.c.bf16 %v401_v63, %v400_v62  ;;  %v3168_v2 = vld [vmem:[%s4859_s3 + $0x90] ss:$8 sps:$4 sm:$0xff]   ;;  %v3171_v7 = vld [vmem:[%s4859_s3 + $0xa0] ss:$8 sps:$4 sm:$0xff]   ;;  %v3172_v8 = vld [vmem:[%s4859_s3 + $0xb4] ss:$8 sps:$4 sm:$0xff]  }
  0x29   : > { %736 = vrot.lane.b32.xlu1 %v3493_v33, %s3323_s8  ;;  %1060 = vmatpush1.bf16.msra.mxu0 %v3153_v35  ;;  %v402_v4 = vld [vmem:[%s3451_s21 + $0xb0] sm:$0xff]  ;;  %v403_v5 = vld [vmem:[%s3451_s21 + $0xb8] sm:$0xff]  ;;  %v404_v10 = vld [vmem:[%s3451_s21 + $0xc0] sm:$0xff]  ;;  %v626_v31 = vor.u32 %v625_v27, %v448_v26  ;;  %v450_v34 = vrot.slane %v448_v26, 7  ;;  %v455_v17 = vshrl.u32 %v3458_v13, 16  ;;  %v627_v40 = vrot.slane %v458_v30, 1 }
  0x2a   : > { %1061 = vmatprep.subr.bf16.mxu0 %v3154_v37  ;;  %v3583_v6 = vpack.c.bf16 %v403_v5, %v402_v4  ;;  %v3174_v9 = vld [vmem:[%s4859_s3 + $0xb0] ss:$8 sps:$4 sm:$0xff]   ;;  %v405_v11 = vld [vmem:[%s3451_s21 + $0xc8] sm:$0xff]  ;;  %v408_v18 = vld [vmem:[%s3451_s21 + $0xe0] sm:$0xff]  ;;  %v462_v55 = vshrl.u32 %v3470_v19, 16  ;;  %v479_v5 = vshll.u32 %v3493_v33, 16 }
  0x2b   : > { %v3598_v12 = vpack.c.bf16 %v405_v11, %v404_v10  ;;  %v406_v14 = vld [vmem:[%s3451_s21 + $0xd0] sm:$0xff]  ;;  %v407_v15 = vld [vmem:[%s3451_s21 + $0xd8] sm:$0xff]  ;;  %v409_v20 = vld [vmem:[%s3451_s21 + $0xe8] sm:$0xff]  ;;  %v687_v37 = vsel %vm3533_vm3, %v626_v31, 0  ;;  %v453_v38 = vor.u32 %v451_v25, %v450_v34  ;;  %v628_v46 = vor.u32 %v627_v40, %v455_v17 }
  0x2c   : > { %738 = vrot.lane.b32.xlu0 %v3505_v39, %s3323_s8  ;;  %v3604_v16 = vpack.c.bf16 %v407_v15, %v406_v14  ;;  %v3610_v21 = vpack.c.bf16 %v409_v20, %v408_v18  ;;  %v410_v22 = vld [vmem:[%s3451_s21 + $0xf0] sm:$0xff]  ;;  %v411_v23 = vld [vmem:[%s3451_s21 + $0xf8] sm:$0xff]  ;;  %vm3622_vm6 = vmand %vm600_vm4, %vm601_vm5  ;;  %v457_v48 = vrot.slane %v455_v17, 7  ;;  %v464_v63 = vrot.slane %v462_v55, 7 }
  0x2d   : > { %740 = vrot.lane.b32.xlu1 %v3511_v42, %s3323_s8  ;;  %1062 = vmatpush1.bf16.msra.mxu0 %v3156_v44  ;;  %v3616_v24 = vpack.c.bf16 %v411_v23, %v410_v22  ;;  %v4876_v29 = vsel %vm3622_vm6, 4294967295, %v4875_v29  ;;  %v603_v35 = vsel %vm3622_vm6, 0, %v3489_v32  ;;  %v465_v32 = vshll.u32 %v3470_v19, 16  ;;  %v416_v43 = vld [vmem:[%s3639_s20] sm:$0xff]  ;;  %v417_v44 = vld [vmem:[%s3639_s20 + $0x8] sm:$0xff] }
  0x2e   : > { %1063 = vmatprep.subr.bf16.mxu0 %v3157_v45  ;;  %4877 = vst [vmem:[#allocation6_spill] sm:$0xff] %v4876_v29  ;;  %v604_v13 = vsel %vm3622_vm6, 0, %v453_v38  ;;  %v3647_v50 = vpack.c.bf16 %v417_v44, %v416_v43  ;;  %v688_v53 = vsel %vm3533_vm3, %v628_v46, 0  ;;  %v469_v19 = vshrl.u32 %v3482_v28, 16 }
  0x2f   : > { %v629_v56 = vrot.slane %v465_v32, 1  ;;  %v633_v18 = vrot.slane %v479_v5, 1  ;;  %v486_v20 = vshll.u32 %v3505_v39, 16  ;;  %v500_v44 = vshll.u32 %v3522_v47, 16 }
  0x30   : > { %742 = vrot.lane.b32.xlu0 %v3522_v47, %s3323_s8  ;;  %v471_v10 = vrot.slane %v469_v19, 7 }
  0x31   : > { %744 = vrot.lane.b32.xlu1 %v3527_v49, %s3323_s8  ;;  %1064 = vmatpush1.bf16.msra.mxu0 %v3159_v51  ;;  %v630_v62 = vor.u32 %v629_v56, %v462_v55  ;;  %v635_v34 = vrot.slane %v486_v20, 1  ;;  %v639_v55 = vrot.slane %v500_v44, 1  ;;  %v507_v56 = vshll.u32 %v3527_v49, 16 }
  0x32   : > { %1065 = vmatprep.subr.bf16.mxu0 %v3160_v54  ;;  %v460_v54 = vor.u32 %v458_v30, %v457_v48 }
  0x34   : > { %746 = vrot.lane.b32.xlu0 %v3546_v57, %s3323_s8 }
  0x35   : > { %748 = vrot.lane.b32.xlu1 %v3557_v60, %s3323_s8  ;;  %1066 = vmatpush1.bf16.msra.mxu0 %v3162_v58  ;;  %v472_v58 = vshll.u32 %v3482_v28, 16  ;;  %v476_v28 = vshrl.u32 %v3493_v33, 16  ;;  %v483_v33 = vshrl.u32 %v3505_v39, 16  ;;  %v490_v39 = vshrl.u32 %v3511_v42, 16 }
  0x36   : > { %1067 = vmatprep.subr.bf16.mxu0 %v3163_v59 }
  0x37   : > { %v631_v4 = vrot.slane %v472_v58, 1  ;;  %v474_v15 = vor.u32 %v472_v58, %v471_v10  ;;  %v634_v25 = vor.u32 %v633_v18, %v476_v28  ;;  %v478_v26 = vrot.slane %v476_v28, 7 }
  0x38   : > { %750 = vrot.lane.b32.xlu0 %v3571_v1, %s3323_s8  ;;  %v636_v38 = vor.u32 %v635_v34, %v483_v33  ;;  %v485_v17 = vrot.slane %v483_v33, 7  ;;  %v492_v48 = vrot.slane %v490_v39, 7 }
  0x39   : > { %1068 = vmatpush1.bf16.msra.mxu0 %v3165_v61  ;;  %752 = vrot.lane.b32.xlu1 %v3583_v6, %s3323_s8  ;;  %v605_v61 = vsel %vm3622_vm6, 0, %v460_v54  ;;  %v607_v23 = vsel %vm3622_vm6, 0, %v474_v15  ;;  %v691_v30 = vsel %vm3533_vm3, %v634_v25, 0  ;;  %v481_v31 = vor.u32 %v479_v5, %v478_v26 }
  0x3a   : > { %1069 = vmatprep.subr.bf16.mxu0 %v3166_v0  ;;  %v521_v15 = vshll.u32 %v3557_v60, 16 }
  0x3c   : > { %754 = vrot.lane.b32.xlu0 %v3598_v12, %s3323_s8 }
  0x3d   : > { %1070 = vmatpush1.bf16.msra.mxu0 %v3168_v2  ;;  %756 = vrot.lane.b32.xlu1 %v3604_v16, %s3323_s8  ;;  %v689_v2 = vsel %vm3533_vm3, %v630_v62, 0 }
  0x3e   : > { %1071 = vmatprep.subr.bf16.mxu0 %v3169_v3  ;;  %v467_v3 = vor.u32 %v465_v32, %v464_v63  ;;  %v488_v32 = vor.u32 %v486_v20, %v485_v17 }
  0x40   : > { %758 = vrot.lane.b32.xlu0 %v3610_v21, %s3323_s8 }
  0x41   : > { %1072 = vmatpush1.bf16.msra.mxu0 %v3171_v7  ;;  %760 = vrot.lane.b32.xlu1 %v3616_v24, %s3323_s8 }
  0x42   : > { %1073 = vmatprep.subr.bf16.mxu0 %v3172_v8  ;;  %v606_v8 = vsel %vm3622_vm6, 0, %v467_v3  ;;  %v641_v3 = vrot.slane %v507_v56, 1 }
  0x44   : > { %762 = vrot.lane.b32.xlu0 %v3647_v50, %s3323_s8 }
  0x45   : > { %1074 = vmatpush1.bf16.msra.mxu0 %v3174_v9  ;;  %v632_v9 = vor.u32 %v631_v4, %v469_v19  ;;  %v514_v19 = vshll.u32 %v3546_v57, 16 }
  0x47   : > { %v690_v14 = vsel %vm3533_vm3, %v632_v9, 0 }
  0x92   : > { %v727_v36 = vpop.permute.xlu0 %726 }
  0x93   : > { %v769_v41 = vsel %vm766_vm2, %v603_v35, %v727_v36  ;;  %v731_v59 = vpop.permute.xlu1 %730  ;;  %v493_v35 = vshll.u32 %v3511_v42, 16  ;;  %v497_v42 = vshrl.u32 %v3522_v47, 16  ;;  %v504_v47 = vshrl.u32 %v3527_v49, 16 }
  0x94   : > { %1084 = vmatmul.mubr.bf16.vlgmr.msra.gmra.mrb[0].mxu0 %v769_v41  ;;  %v777_v0 = vsel %vm766_vm2, %v605_v61, %v731_v59  ;;  %v692_v41 = vsel %vm3533_vm3, %v636_v38, 0  ;;  %v511_v49 = vshrl.u32 %v3546_v57, 16  ;;  %v518_v57 = vshrl.u32 %v3557_v60, 16 }
  0x95   : > { %3009 = vmatprep.mubr.msk.bf16.mxu0 %vm766_vm2, %v687_v37  ;;  %v608_v37 = vsel %vm3622_vm6, 0, %v481_v31  ;;  %v637_v43 = vrot.slane %v493_v35, 1  ;;  %v495_v54 = vor.u32 %v493_v35, %v492_v48  ;;  %v640_v61 = vor.u32 %v639_v55, %v497_v42 }
  0x96   : > { %v729_v45 = vpop.permute.xlu0 %728  ;;  %v499_v62 = vrot.slane %v497_v42, 7  ;;  %v520_v35 = vrot.slane %v518_v57, 7  ;;  %v525_v38 = vshrl.u32 %v3571_v1, 16 }
  0x97   : > { %v773_v51 = vsel %vm766_vm2, %v604_v13, %v729_v45  ;;  %v733_v7 = vpop.permute.xlu1 %732  ;;  %v609_v13 = vsel %vm3622_vm6, 0, %v488_v32  ;;  %v638_v46 = vor.u32 %v637_v43, %v490_v39  ;;  %v610_v59 = vsel %vm3622_vm6, 0, %v495_v54 }
  0x98   : > { %v781_v11 = vsel %vm766_vm2, %v606_v8, %v733_v7  ;;  %v642_v7 = vor.u32 %v641_v3, %v504_v47  ;;  %v506_v8 = vrot.slane %v504_v47, 7  ;;  %v523_v60 = vor.u32 %v521_v15, %v520_v35 }
  0x99   : > { %v527_v43 = vrot.slane %v525_v38, 7  ;;  %v542_v54 = vshll.u32 %v3598_v12, 16 }
  0x9a   : > { %v735_v22 = vpop.permute.xlu0 %734  ;;  %v695_v10 = vsel %vm3533_vm3, %v642_v7, 0  ;;  %v614_v32 = vsel %vm3622_vm6, 0, %v523_v60 }
  0x9b   : > { %v785_v27 = vsel %vm766_vm2, %v607_v23, %v735_v22  ;;  %v737_v36 = vpop.permute.xlu1 %736  ;;  %v513_v22 = vrot.slane %v511_v49, 7 }
  0x9c   : > { %1092 = vmatmul.mubr.bf16.gmra.mrb[4].mxu0 %v773_v51  ;;  %v789_v40 = vsel %vm766_vm2, %v608_v37, %v737_v36 }
  0x9d   : > { %3010 = vmatprep.mubr.msk.bf16.mxu0 %vm766_vm2, %v688_v53  ;;  %v693_v53 = vsel %vm3533_vm3, %v638_v46, 0  ;;  %v516_v26 = vor.u32 %v514_v19, %v513_v22  ;;  %v563_v22 = vshll.u32 %v3616_v24, 16 }
  0x9e   : > { %v739_v45 = vpop.permute.xlu0 %738 }
  0x9f   : > { %v793_v51 = vsel %vm766_vm2, %v609_v13, %v739_v45  ;;  %v741_v58 = vpop.permute.xlu1 %740  ;;  %v613_v33 = vsel %vm3622_vm6, 0, %v516_v26  ;;  %v419_v45 = vld [vmem:[%s3639_s20 + $0x18] sm:$0xff] }
  0xa0   : > { %v797_v63 = vsel %vm766_vm2, %v610_v59, %v741_v58 }
  0xa2   : > { %v743_v4 = vpop.permute.xlu0 %742 }
  0xa3   : > { %v745_v28 = vpop.permute.xlu1 %744 }
  0xa4   : > { %1100 = vmatmul.mubr.bf16.gmra.mrb[8].mxu0 %v777_v0  ;;  %v694_v0 = vsel %vm3533_vm3, %v640_v61, 0 }
  0xa5   : > { %3011 = vmatprep.mubr.msk.bf16.mxu0 %vm766_vm2, %v689_v2  ;;  %v502_v2 = vor.u32 %v500_v44, %v499_v62  ;;  %v418_v44 = vld [vmem:[%s3639_s20 + $0x10] sm:$0xff]  ;;  %v539_v62 = vshrl.u32 %v3598_v12, 16  ;;  %v546_v12 = vshrl.u32 %v3604_v16, 16  ;;  %s3243_s20 = scalar_lea.vmem %s4801_s15, 4096 }
  0xa6   : > { %v747_v31 = vpop.permute.xlu0 %746  ;;  %v3734_v46 = vpack.c.bf16 %v419_v45, %v418_v44  ;;  %p3244_p12 = scmp.ne.s32.totalorder %s4801_s15, %s3243_s20  ;;  %p3251_p2 = scmp.lt.s32.totalorder %s3249_s22, %s3243_s20 }
  0xa7   : > { %v611_v5 = vsel %vm3622_vm6, 0, %v502_v2  ;;  %v809_v36 = vsel %vm766_vm2, %v613_v33, %v747_v31  ;;  %v657_v33 = vrot.slane %v563_v22, 1 }
  0xa8   : > { %v801_v9 = vsel %vm766_vm2, %v611_v5, %v743_v4  ;;  %764 = vrot.lane.b32.xlu1 %v3734_v46, %s3323_s8  ;;  %v574_v45 = vshrl.u32 %v3734_v46, 16  ;;  %p3245_p13 = pnand %p3244_p12, %p3407_p4  ;;  %p3252_p3 = por %p3251_p2, %p3250_p1 }
  0xaa   : > { %v751_v42 = vpop.permute.xlu0 %750  ;;  %p3246_p0 = pneg %p3245_p13 }
  0xac   : > { %1110 = vmatmul.mubr.bf16.gmra.mrb[12].mxu0 %v781_v11  ;;  %v509_v11 = vor.u32 %v507_v56, %v506_v8  ;;  %p3253_p5 = pnand %p3252_p3, %p3246_p0 }
  0xad   : > { %3012 = vmatprep.mubr.msk.bf16.mxu0 %vm766_vm2, %v690_v14  ;;  %v643_v14 = vrot.slane %v514_v19, 1  ;;  %v541_v19 = vrot.slane %v539_v62, 7 }
  0xae   : > { %v612_v18 = vsel %vm3622_vm6, 0, %v509_v11 }
  0xaf   : > { %v644_v20 = vor.u32 %v643_v14, %v511_v49  ;;  %v805_v23 = vsel %vm766_vm2, %v612_v18, %v745_v28  ;;  %v544_v7 = vor.u32 %v542_v54, %v541_v19  ;;  %v548_v14 = vrot.slane %v546_v12, 7 }
  0xb1   : > { %v696_v25 = vsel %vm3533_vm3, %v644_v20, 0  ;;  %v617_v11 = vsel %vm3622_vm6, 0, %v544_v7 }
  0xb4   : > { %1120 = vmatmul.mubr.bf16.gmra.mrb[16].mxu0 %v785_v27  ;;  %v645_v27 = vrot.slane %v521_v15, 1 }
  0xb5   : > { %3013 = vmatprep.mubr.msk.bf16.mxu0 %vm766_vm2, %v691_v30  ;;  %v528_v30 = vshll.u32 %v3571_v1, 16 }
  0xb6   : > { %v646_v34 = vor.u32 %v645_v27, %v518_v57 }
  0xb7   : > { %v647_v17 = vrot.slane %v528_v30, 1  ;;  %v530_v48 = vor.u32 %v528_v30, %v527_v43  ;;  %v567_v43 = vshrl.u32 %v3647_v50, 16 }
  0xb8   : > { %v697_v37 = vsel %vm3533_vm3, %v646_v34, 0 }
  0xb9   : > { %v648_v39 = vor.u32 %v647_v17, %v525_v38  ;;  %v615_v55 = vsel %vm3622_vm6, 0, %v530_v48  ;;  %v569_v48 = vrot.slane %v567_v43, 7 }
  0xba   : > { %v817_v59 = vsel %vm766_vm2, %v615_v55, %v751_v42 }
  0xbb   : > { %v698_v1 = vsel %vm3533_vm3, %v648_v39, 0  ;;  %v577_v39 = vshll.u32 %v3734_v46, 16  ;;  %v576_v46 = vrot.slane %v574_v45, 7 }
  0xbc   : > { %1130 = vmatmul.mubr.bf16.gmra.mrb[20].mxu0 %v789_v40  ;;  %v535_v40 = vshll.u32 %v3583_v6, 16 }
  0xbd   : > { %3014 = vmatprep.mubr.msk.bf16.mxu0 %vm766_vm2, %v692_v41  ;;  %v749_v41 = vpop.permute.xlu1 %748 }
  0xbe   : > { %v813_v13 = vsel %vm766_vm2, %v614_v32, %v749_v41  ;;  %v570_v32 = vshll.u32 %v3647_v50, 16 }
  0xc0   : > { %v659_v44 = vrot.slane %v570_v32, 1  ;;  %v572_v42 = vor.u32 %v570_v32, %v569_v48  ;;  %v3178_v32 = vld [vmem:[%s4861_s5 + $0x14] ss:$8 sps:$4 sm:$0xff]  }
  0xc1   : > { %v753_v2 = vpop.permute.xlu1 %752  ;;  %v3184_v48 = vld [vmem:[%s4861_s5 + $0x34] ss:$8 sps:$4 sm:$0xff]  }
  0xc2   : > { %v621_v55 = vsel %vm3622_vm6, 0, %v572_v42 }
  0xc4   : > { %1140 = vmatmul.mubr.bf16.gmra.mrb[24].mxu0 %v793_v51  ;;  %v532_v51 = vshrl.u32 %v3583_v6, 16 }
  0xc5   : > { %3015 = vmatprep.mubr.msk.bf16.mxu0 %vm766_vm2, %v693_v53  ;;  %v649_v53 = vrot.slane %v535_v40, 1 }
  0xc6   : > { %v534_v58 = vrot.slane %v532_v51, 7 }
  0xc7   : > { %v650_v56 = vor.u32 %v649_v53, %v532_v51 }
  0xc8   : > { %v537_v61 = vor.u32 %v535_v40, %v534_v58  ;;  %v579_v58 = vor.u32 %v577_v39, %v576_v46  ;;  %v3190_v46 = vld [vmem:[%s4861_s5 + $0x54] ss:$8 sps:$4 sm:$0xff]  }
  0xc9   : > { %v699_v6 = vsel %vm3533_vm3, %v650_v56, 0 }
  0xca   : > { %v616_v47 = vsel %vm3622_vm6, 0, %v537_v61 }
  0xcb   : > { %v821_v4 = vsel %vm766_vm2, %v616_v47, %v753_v2 }
  0xcc   : > { %1150 = vmatmul.mubr.bf16.gmra.mrb[28].mxu0 %v797_v63  ;;  %v651_v63 = vrot.slane %v542_v54, 1 }
  0xcd   : > { %3016 = vmatprep.mubr.msk.bf16.mxu0 %vm766_vm2, %v694_v0  ;;  %v549_v0 = vshll.u32 %v3604_v16, 16  ;;  %v553_v16 = vshrl.u32 %v3610_v21, 16 }
  0xce   : > { %v652_v3 = vor.u32 %v651_v63, %v539_v62 }
  0xcf   : > { %v653_v8 = vrot.slane %v549_v0, 1  ;;  %v551_v18 = vor.u32 %v549_v0, %v548_v14  ;;  %v555_v57 = vrot.slane %v553_v16, 7 }
  0xd0   : > { %v700_v5 = vsel %vm3533_vm3, %v652_v3, 0 }
  0xd1   : > { %v654_v49 = vor.u32 %v653_v8, %v546_v12 }
  0xd3   : > { %v701_v28 = vsel %vm3533_vm3, %v654_v49, 0 }
  0xd4   : > { %1160 = vmatmul.mubr.bf16.gmra.mrb[32].mxu0 %v801_v9  ;;  %v556_v9 = vshll.u32 %v3610_v21, 16  ;;  %v560_v21 = vshrl.u32 %v3616_v24, 16 }
  0xd5   : > { %3017 = vmatprep.mubr.msk.bf16.mxu0 %vm766_vm2, %v695_v10  ;;  %v755_v10 = vpop.permute.xlu0 %754 }
  0xd6   : > { %v825_v15 = vsel %vm766_vm2, %v617_v11, %v755_v10  ;;  %v655_v20 = vrot.slane %v556_v9, 1  ;;  %v558_v31 = vor.u32 %v556_v9, %v555_v57 }
  0xd8   : > { %v656_v26 = vor.u32 %v655_v20, %v553_v16  ;;  %v619_v35 = vsel %vm3622_vm6, 0, %v558_v31 }
  0xd9   : > { %v759_v34 = vpop.permute.xlu0 %758 }
  0xda   : > { %v702_v30 = vsel %vm3533_vm3, %v656_v26, 0  ;;  %v833_v60 = vsel %vm766_vm2, %v619_v35, %v759_v34 }
  0xdc   : > { %1170 = vmatmul.mubr.bf16.gmra.mrb[36].mxu0 %v805_v23  ;;  %v757_v23 = vpop.permute.xlu1 %756 }
  0xdd   : > { %3018 = vmatprep.mubr.msk.bf16.mxu0 %vm766_vm2, %v696_v25  ;;  %v618_v25 = vsel %vm3622_vm6, 0, %v551_v18  ;;  %v763_v53 = vpop.permute.xlu0 %762 }
  0xde   : > { %v829_v27 = vsel %vm766_vm2, %v618_v25, %v757_v23  ;;  %v841_v56 = vsel %vm766_vm2, %v621_v55, %v763_v53  ;;  %v3186_v53 = vld [vmem:[%s4861_s5 + $0x30] ss:$8 sps:$4 sm:$0xff]  }
  0xe0   : > { %v761_v24 = vpop.permute.xlu1 %760 }
  0xe4   : > { %1180 = vmatmul.mubr.bf16.gmra.mrb[40].mxu0 %v809_v36  ;;  %v658_v36 = vor.u32 %v657_v33, %v560_v21 }
  0xe5   : > { %3019 = vmatprep.mubr.msk.bf16.mxu0 %vm766_vm2, %v697_v37  ;;  %v562_v37 = vrot.slane %v560_v21, 7 }
  0xe6   : > { %v703_v38 = vsel %vm3533_vm3, %v658_v36, 0 }
  0xe7   : > { %v565_v17 = vor.u32 %v563_v22, %v562_v37 }
  0xe9   : > { %v620_v40 = vsel %vm3622_vm6, 0, %v565_v17 }
  0xea   : > { %v837_v41 = vsel %vm766_vm2, %v620_v40, %v761_v24  ;;  %v3175_v24 = vld [vmem:[%s4861_s5 + $0x4] ss:$8 sps:$4 sm:$0xff]   ;;  %v3177_v40 = vld [vmem:[%s4861_s5] ss:$8 sps:$4 sm:$0xff]  }
  0xeb   : > { %2233 = vmatprep.subr.bf16.mxu1 %v3175_v24 }
  0xec   : > { %1190 = vmatmul.mubr.bf16.gmra.mrb[44].mxu0 %v813_v13  ;;  %v661_v13 = vrot.slane %v577_v39, 1  ;;  %2234 = vmatpush1.bf16.msra.mxu1 %v3177_v40  ;;  %v3180_v39 = vld [vmem:[%s4861_s5 + $0x10] ss:$8 sps:$4 sm:$0xff]  }
  0xed   : > { %3020 = vmatprep.mubr.msk.bf16.mxu0 %vm766_vm2, %v698_v1  ;;  %v660_v1 = vor.u32 %v659_v44, %v567_v43  ;;  %2235 = vmatprep.subr.bf16.mxu1 %v3178_v32  ;;  %v3181_v43 = vld [vmem:[%s4861_s5 + $0x24] ss:$8 sps:$4 sm:$0xff]   ;;  %v3198_v40 = vld [vmem:[%s4861_s5 + $0x70] ss:$8 sps:$4 sm:$0xff]  }
  0xee   : > { %v662_v51 = vor.u32 %v661_v13, %v574_v45  ;;  %v3183_v13 = vld [vmem:[%s4861_s5 + $0x20] ss:$8 sps:$4 sm:$0xff]   ;;  %v3199_v32 = vld [vmem:[%s4861_s5 + $0x84] ss:$8 sps:$4 sm:$0xff]  }
  0xef   : > { %v704_v54 = vsel %vm3533_vm3, %v660_v1, 0 }
  0xf0   : > { %v705_v50 = vsel %vm3533_vm3, %v662_v51, 0  ;;  %2236 = vmatpush1.bf16.msra.mxu1 %v3180_v39 }
  0xf1   : > { %2237 = vmatprep.subr.bf16.mxu1 %v3181_v43 }
  0xf4   : > { %1200 = vmatmul.mubr.bf16.gmra.mrb[48].mxu0 %v817_v59  ;;  %v622_v59 = vsel %vm3622_vm6, 0, %v579_v58  ;;  %2238 = vmatpush1.bf16.msra.mxu1 %v3183_v13  ;;  %v3201_v13 = vld [vmem:[%s4861_s5 + $0x80] ss:$8 sps:$4 sm:$0xff]  }
  0xf5   : > { %3021 = vmatprep.mubr.msk.bf16.mxu0 %vm766_vm2, %v699_v6  ;;  %2239 = vmatprep.subr.bf16.mxu1 %v3184_v48 }
  0xf8   : > { %2240 = vmatpush1.bf16.msra.mxu1 %v3186_v53  ;;  %v3202_v53 = vld [vmem:[%s4861_s5 + $0x94] ss:$8 sps:$4 sm:$0xff]  }
  0xfc   : > { %1210 = vmatmul.mubr.bf16.gmra.mrb[52].mxu0 %v821_v4 }
  0xfd   : > { %3022 = vmatprep.mubr.msk.bf16.mxu0 %vm766_vm2, %v700_v5 }
 0x104   : > { %1220 = vmatmul.mubr.bf16.gmra.mrb[56].mxu0 %v825_v15 }
 0x105   : > { %3023 = vmatprep.mubr.msk.bf16.mxu0 %vm766_vm2, %v701_v28 }
 0x10c   : > { %1230 = vmatmul.mubr.bf16.gmra.mrb[60].mxu0 %v829_v27 }
 0x10d   : > { %3024 = vmatprep.mubr.msk.bf16.mxu0 %vm766_vm2, %v702_v30 }
 0x114   : > { %1240 = vmatmul.mubr.bf16.gmra.mrb[64].mxu0 %v833_v60 }
 0x115   : > { %3025 = vmatprep.mubr.msk.bf16.mxu0 %vm766_vm2, %v703_v38 }
 0x11a   : > { %v765_v6 = vpop.permute.xlu1 %764 }
 0x11b   : > { %v845_v61 = vsel %vm766_vm2, %v622_v59, %v765_v6  ;;  %v3192_v59 = vld [vmem:[%s4861_s5 + $0x50] ss:$8 sps:$4 sm:$0xff]   ;;  %v3193_v6 = vld [vmem:[%s4861_s5 + $0x64] ss:$8 sps:$4 sm:$0xff]  }
 0x11c   : > { %1250 = vmatmul.mubr.bf16.gmra.mrb[68].mxu0 %v837_v41 }
 0x11d   : > { %3026 = vmatprep.mubr.msk.bf16.mxu0 %vm766_vm2, %v704_v54  ;;  %v3187_v54 = vld [vmem:[%s4861_s5 + $0x44] ss:$8 sps:$4 sm:$0xff]  }
 0x11e   : > { %2241 = vmatprep.subr.bf16.mxu1 %v3187_v54 }
 0x124   : > { %1260 = vmatmul.mubr.bf16.gmra.mrb[72].mxu0 %v841_v56 }
 0x125   : > { %3027 = vmatprep.mubr.msk.bf16.mxu0 %vm766_vm2, %v705_v50  ;;  %v3189_v50 = vld [vmem:[%s4861_s5 + $0x40] ss:$8 sps:$4 sm:$0xff]  }
 0x126   : > { %2242 = vmatpush1.bf16.msra.mxu1 %v3189_v50  ;;  %v3204_v50 = vld [vmem:[%s4861_s5 + $0x90] ss:$8 sps:$4 sm:$0xff]  }
 0x127   : > { %2243 = vmatprep.subr.bf16.mxu1 %v3190_v46  ;;  %v3205_v46 = vld [vmem:[%s4861_s5 + $0xa4] ss:$8 sps:$4 sm:$0xff]  }
 0x12a   : > { %2244 = vmatpush1.bf16.msra.mxu1 %v3192_v59 }
 0x12b   : > { %2245 = vmatprep.subr.bf16.mxu1 %v3193_v6 }
 0x12c   : > { %1270 = vmatmul.mubr.bf16.gmra.mrb[76].mxu0 %v845_v61 }
 0x167   : > { %v3799_v62 = vpop.f32.mrb[0].mxu0 }
 0x168   : > { %v1087_v63 = vpop.f32.mrb[1].mxu0 }
 0x169   : > { %v3801_v0 = vpop.f32.mrb[2].mxu0 }
 0x16a   : > { %v1090_v2 = vpop.f32.mrb[3].mxu0 }
 0x16b   : > { %v3195_v2 = vld [vmem:[%s4861_s5 + $0x60] ss:$8 sps:$4 sm:$0xff]  }
 0x16c   : > { %2246 = vmatpush1.bf16.msra.mxu1 %v3195_v2  ;;  %v3207_v2 = vld [vmem:[%s4861_s5 + $0xa0] ss:$8 sps:$4 sm:$0xff]  }
 0x16f   : > { %v3803_v47 = vpop.f32.mrb[4].mxu0 }
 0x170   : > { %v1095_v3 = vpop.f32.mrb[5].mxu0  ;;  %1314 = vrot.lane.b32.xlu0 %v3803_v47, %s3323_s8 }
 0x171   : > { %v3807_v19 = vpop.f32.mrb[6].mxu0 }
 0x172   : > { %v1098_v4 = vpop.f32.mrb[7].mxu0  ;;  %1316 = vrot.lane.b32.xlu1 %v3807_v19, %s3323_s8 }
 0x173   : > { %v3196_v4 = vld [vmem:[%s4861_s5 + $0x74] ss:$8 sps:$4 sm:$0xff]  }
 0x174   : > { %2247 = vmatprep.subr.bf16.mxu1 %v3196_v4 }
 0x175   : > { %2248 = vmatpush1.bf16.msra.mxu1 %v3198_v40  ;;  %v3208_v40 = vld [vmem:[%s4861_s5 + $0xb4] ss:$8 sps:$4 sm:$0xff]  }
 0x176   : > { %2249 = vmatprep.subr.bf16.mxu1 %v3199_v32 }
 0x177   : > { %v3811_v5 = vpop.f32.mrb[8].mxu0 }
 0x178   : > { %1318 = vrot.lane.b32.xlu0 %v3811_v5, %s3323_s8  ;;  %v3815_v7 = vpop.f32.mrb[9].mxu0 }
 0x179   : > { %v3817_v12 = vpop.f32.mrb[10].mxu0  ;;  %2250 = vmatpush1.bf16.msra.mxu1 %v3201_v13  ;;  %v3210_v13 = vld [vmem:[%s4861_s5 + $0xb0] ss:$8 sps:$4 sm:$0xff]  }
 0x17a   : > { %1320 = vrot.lane.b32.xlu1 %v3817_v12, %s3323_s8  ;;  %v3821_v8 = vpop.f32.mrb[11].mxu0  ;;  %2251 = vmatprep.subr.bf16.mxu1 %v3202_v53 }
 0x17d   : > { %2252 = vmatpush1.bf16.msra.mxu1 %v3204_v50 }
 0x17e   : > { %2253 = vmatprep.subr.bf16.mxu1 %v3205_v46 }
 0x17f   : > { %v3823_v9 = vpop.f32.mrb[12].mxu0 }
 0x180   : > { %1322 = vrot.lane.b32.xlu0 %v3823_v9, %s3323_s8  ;;  %v3827_v10 = vpop.f32.mrb[13].mxu0 }
 0x181   : > { %v3829_v11 = vpop.f32.mrb[14].mxu0  ;;  %2254 = vmatpush1.bf16.msra.mxu1 %v3207_v2  ;;  %v4033_v2 = vld [vmem:[%s4860_s4] ss:$0 sm:$0xff] }
 0x182   : > { %1324 = vrot.lane.b32.xlu1 %v3829_v11, %s3323_s8  ;;  %v3833_v49 = vpop.f32.mrb[15].mxu0  ;;  %2255 = vmatprep.subr.bf16.mxu1 %v3208_v40 }
 0x185   : > { %2256 = vmatpush1.bf16.msra.mxu1 %v3210_v13 }
 0x187   : > { %v3835_v14 = vpop.f32.mrb[16].mxu0 }
 0x188   : > { %1326 = vrot.lane.b32.xlu0 %v3835_v14, %s3323_s8  ;;  %v3839_v15 = vpop.f32.mrb[17].mxu0 }
 0x189   : > { %v3841_v28 = vpop.f32.mrb[18].mxu0 }
 0x18a   : > { %1328 = vrot.lane.b32.xlu1 %v3841_v28, %s3323_s8  ;;  %v3845_v18 = vpop.f32.mrb[19].mxu0 }
 0x18f   : > { %v3847_v16 = vpop.f32.mrb[20].mxu0 }
 0x190   : > { %1330 = vrot.lane.b32.xlu0 %v3847_v16, %s3323_s8  ;;  %v3851_v20 = vpop.f32.mrb[21].mxu0 }
 0x191   : > { %v3853_v22 = vpop.f32.mrb[22].mxu0 }
 0x192   : > { %1332 = vrot.lane.b32.xlu1 %v3853_v22, %s3323_s8  ;;  %v3857_v23 = vpop.f32.mrb[23].mxu0 }
 0x197   : > { %v3859_v25 = vpop.f32.mrb[24].mxu0 }
 0x198   : > { %1334 = vrot.lane.b32.xlu0 %v3859_v25, %s3323_s8  ;;  %v3863_v26 = vpop.f32.mrb[25].mxu0 }
 0x199   : > { %v3865_v57 = vpop.f32.mrb[26].mxu0 }
 0x19a   : > { %1336 = vrot.lane.b32.xlu1 %v3865_v57, %s3323_s8  ;;  %v3869_v27 = vpop.f32.mrb[27].mxu0 }
 0x19f   : > { %v3871_v30 = vpop.f32.mrb[28].mxu0 }
 0x1a0   : > { %1338 = vrot.lane.b32.xlu0 %v3871_v30, %s3323_s8  ;;  %v3875_v31 = vpop.f32.mrb[29].mxu0 }
 0x1a1   : > { %v3877_v21 = vpop.f32.mrb[30].mxu0 }
 0x1a2   : > { %1340 = vrot.lane.b32.xlu1 %v3877_v21, %s3323_s8  ;;  %v3881_v33 = vpop.f32.mrb[31].mxu0 }
 0x1a7   : > { %v3883_v34 = vpop.f32.mrb[32].mxu0 }
 0x1a8   : > { %1342 = vrot.lane.b32.xlu0 %v3883_v34, %s3323_s8  ;;  %v3887_v35 = vpop.f32.mrb[33].mxu0 }
 0x1a9   : > { %v3889_v36 = vpop.f32.mrb[34].mxu0 }
 0x1aa   : > { %1344 = vrot.lane.b32.xlu1 %v3889_v36, %s3323_s8  ;;  %v3893_v37 = vpop.f32.mrb[35].mxu0 }
 0x1af   : > { %v3895_v60 = vpop.f32.mrb[36].mxu0 }
 0x1b0   : > { %4878 = vst [vmem:[#allocation7_spill] sm:$0xff] %v3895_v60  ;;  %1346 = vrot.lane.b32.xlu0 %v3895_v60, %s3323_s8  ;;  %v3899_v38 = vpop.f32.mrb[37].mxu0 }
 0x1b1   : > { %v3901_v17 = vpop.f32.mrb[38].mxu0 }
 0x1b2   : > { %4879 = vst [vmem:[#allocation8_spill] sm:$0xff] %v3901_v17  ;;  %1348 = vrot.lane.b32.xlu1 %v3901_v17, %s3323_s8  ;;  %v3911_v41 = vpop.f32.mrb[39].mxu0 }
 0x1b7   : > { %v3922_v44 = vpop.f32.mrb[40].mxu0 }
 0x1b8   : > { %4880 = vst [vmem:[#allocation9_spill] sm:$0xff] %v3922_v44  ;;  %1350 = vrot.lane.b32.xlu1 %v3922_v44, %s3323_s8  ;;  %v3926_v45 = vpop.f32.mrb[41].mxu0 }
 0x1b9   : > { %v3931_v1 = vpop.f32.mrb[42].mxu0 }
 0x1ba   : > { %v3936_v51 = vpop.f32.mrb[43].mxu0 }
 0x1bb   : > { %4881 = vst [vmem:[#allocation10_spill] sm:$0xff] %v3936_v51 }
 0x1bf   : > { %v3944_v42 = vpop.f32.mrb[44].mxu0 }
 0x1c0   : > { %v3946_v55 = vpop.f32.mrb[45].mxu0 }
 0x1c1   : > { %4882 = vst [vmem:[#allocation11_spill] sm:$0xff] %v3946_v55  ;;  %v3951_v56 = vpop.f32.mrb[46].mxu0 }
 0x1c2   : > { %v3956_v58 = vpop.f32.mrb[47].mxu0 }
 0x1c3   : > { %4883 = vst [vmem:[#allocation12_spill] sm:$0xff] %v3956_v58 }
 0x1c7   : > { %v3964_v61 = vpop.f32.mrb[48].mxu0 }
 0x1c8   : > { %v3966_v63 = vpop.f32.mrb[49].mxu0 }
 0x1c9   : > { %4884 = vst [vmem:[#allocation13_spill] sm:$0xff] %v3966_v63  ;;  %v3971_v3 = vpop.f32.mrb[50].mxu0 }
 0x1ca   : > { %v3976_v24 = vpop.f32.mrb[51].mxu0 }
 0x1cb   : > { %4885 = vst [vmem:[#allocation14_spill] sm:$0xff] %v3976_v24 }
 0x1cf   : > { %v3984_v39 = vpop.f32.mrb[52].mxu0 }
 0x1d0   : > { %v3986_v43 = vpop.f32.mrb[53].mxu0 }
 0x1d1   : > { %4886 = vst [vmem:[#allocation15_spill] sm:$0xff] %v3986_v43  ;;  %v3991_v48 = vpop.f32.mrb[54].mxu0 }
 0x1d2   : > { %v3996_v54 = vpop.f32.mrb[55].mxu0 }
 0x1d3   : > { %4887 = vst [vmem:[#allocation16_spill] sm:$0xff] %v3996_v54 }
 0x1d7   : > { %v4004_v59 = vpop.f32.mrb[56].mxu0 }
 0x1d8   : > { %v4006_v6 = vpop.f32.mrb[57].mxu0 }
 0x1d9   : > { %4888 = vst [vmem:[#allocation17_spill] sm:$0xff] %v4006_v6  ;;  %v4011_v4 = vpop.f32.mrb[58].mxu0 }
 0x1da   : > { %v4016_v32 = vpop.f32.mrb[59].mxu0 }
 0x1db   : > { %4889 = vst [vmem:[#allocation18_spill] sm:$0xff] %v4016_v32 }
 0x1df   : > { %v4021_v53 = vpop.f32.mrb[60].mxu0 }
 0x1e0   : > { %v4023_v50 = vpop.f32.mrb[61].mxu0 }
 0x1e1   : > { %4890 = vst [vmem:[#allocation19_spill] sm:$0xff] %v4023_v50  ;;  %v4025_v6 = vpop.f32.mrb[62].mxu0 }
 0x1e2   : > { %v1315_v46 = vpop.permute.xlu0 %1314  ;;  %v4027_v54 = vpop.f32.mrb[63].mxu0 }
 0x1e3   : > { %4891 = vst [vmem:[#allocation20_spill] sm:$0xff] %v4027_v54  ;;  %v1422_v43 = vadd.f32 %v1315_v46, %v3799_v62 }
 0x1e4   : > { %v1317_v32 = vpop.permute.xlu1 %1316 }
 0x1e5   : > { %v1458_v40 = vadd.f32 %v1422_v43, %v3815_v7  ;;  %v1423_v24 = vadd.f32 %v1317_v32, %v3801_v0 }
 0x1e7   : > { %v1501_v50 = vadd.f32 %v4033_v2, %v1458_v40  ;;  %v1459_v13 = vadd.f32 %v1423_v24, %v3821_v8  ;;  %v4039_v63 = vpop.f32.mrb[64].mxu0 }
 0x1e8   : > { %v4041_v44 = vpop.f32.mrb[65].mxu0 }
 0x1e9   : > { %4892 = vst [vmem:[#allocation21_spill] sm:$0xff] %v4041_v44  ;;  %v1573_v54 = vmul.f32 0.2, %v1501_v50  ;;  %v1502_v62 = vadd.f32 %v4033_v2, %v1459_v13  ;;  %vm1537_vm7 = vcmp.ge.f32.partialorder %v1501_v50, 0.0  ;;  %v4044_v46 = vpop.f32.mrb[66].mxu0 }
 0x1ea   : > { %v1319_v58 = vpop.permute.xlu0 %1318  ;;  %v4046_v17 = vpop.f32.mrb[67].mxu0 }
 0x1eb   : > { %4893 = vst [vmem:[#allocation22_spill] sm:$0xff] %v4046_v17  ;;  %v1574_v7 = vmul.f32 0.2, %v1502_v62  ;;  %v1424_v0 = vadd.f32 %v1319_v58, %v3803_v47  ;;  %vm1538_vm8 = vcmp.ge.f32.partialorder %v1502_v62, 0.0  ;;  %v1609_v43 = vsel %vm1537_vm7, %v1501_v50, %v1573_v54 }
 0x1ec   : > { %v1321_v32 = vpop.permute.xlu1 %1320  ;;  %v1652_v44 = vmul.f32 0.0, %v1609_v43 }
 0x1ed   : > { %v1460_v8 = vadd.f32 %v1424_v0, %v3827_v10  ;;  %v1425_v24 = vadd.f32 %v1321_v32, %v3807_v19  ;;  %v1610_v40 = vsel %vm1538_vm8, %v1502_v62, %v1574_v7 }
 0x1ee   : > { %v1653_v29 = vmul.f32 0.0, %v1610_v40 }
 0x1ef   : > { %v1503_v13 = vadd.f32 %v4033_v2, %v1460_v8  ;;  %v1461_v55 = vadd.f32 %v1425_v24, %v3833_v49  ;;  %v4053_v60 = vpop.f32.mrb[68].mxu0 }
 0x1f0   : > { %v1657_v17 = vpack.c.bf16 %v1653_v29, %v1652_v44  ;;  %v4055_v51 = vpop.f32.mrb[69].mxu0 }
 0x1f1   : > { %v1575_v47 = vmul.f32 0.2, %v1503_v13  ;;  %v1504_v58 = vadd.f32 %v4033_v2, %v1461_v55  ;;  %v4058_v54 = vpop.f32.mrb[70].mxu0  ;;  %vm1539_vm9 = vcmp.ge.f32.partialorder %v1503_v13, 0.0 }
 0x1f2   : > { %v1323_v10 = vpop.permute.xlu0 %1322  ;;  %1927 = vrot.lane.b32.xlu0 %v1657_v17, %s3323_s8  ;;  %v1676_v19 = vshrl.u32 %v1657_v17, 16  ;;  %v1679_v50 = vshll.u32 %v1657_v17, 16  ;;  %v4061_v62 = vpop.f32.mrb[71].mxu0 }
 0x1f3   : > { %v1576_v7 = vmul.f32 0.2, %v1504_v58  ;;  %v1426_v49 = vadd.f32 %v1323_v10, %v3811_v5  ;;  %vm1540_vm10 = vcmp.ge.f32.partialorder %v1504_v58, 0.0  ;;  %v1611_v32 = vsel %vm1539_vm9, %v1503_v13, %v1575_v47 }
 0x1f4   : > { %v1325_v29 = vpop.permute.xlu1 %1324  ;;  %v1678_v44 = vrot.slane %v1676_v19, 7  ;;  %v1837_v0 = vrot.slane %v1679_v50, 1 }
 0x1f5   : > { %v1462_v43 = vadd.f32 %v1426_v49, %v3839_v15  ;;  %v1427_v55 = vadd.f32 %v1325_v29, %v3817_v12  ;;  %v1612_v8 = vsel %vm1540_vm10, %v1504_v58, %v1576_v7 }
 0x1f6   : > { %1352 = vrot.lane.b32.xlu0 %v3931_v1, %s3323_s8  ;;  %v4068_v24 = vpack.c.bf16 %v1612_v8, %v1611_v32  ;;  %v1838_v17 = vor.u32 %v1837_v0, %v1676_v19  ;;  %v4070_v40 = vor.u32 %v1679_v50, %v1678_v44 }
 0x1f7   : > { %v1505_v5 = vadd.f32 %v4033_v2, %v1462_v43  ;;  %v1463_v10 = vadd.f32 %v1427_v55, %v3845_v18 }
 0x1f8   : > { %1929 = vrot.lane.b32.xlu1 %v4068_v24, %s3323_s8  ;;  %v1891_v12 = vsel %vm3533_vm3, %v1838_v17, 0 }
 0x1f9   : > { %v1577_v15 = vmul.f32 0.2, %v1505_v5  ;;  %v1506_v13 = vadd.f32 %v4033_v2, %v1463_v10  ;;  %3053 = vmatprep.mubr.msk.bf16.mxu1 %vm766_vm2, %v1891_v12  ;;  %vm1541_vm11 = vcmp.ge.f32.partialorder %v1505_v5, 0.0 }
 0x1fa   : > { %v1327_v47 = vpop.permute.xlu0 %1326  ;;  %1354 = vrot.lane.b32.xlu0 %v3944_v42, %s3323_s8 }
 0x1fb   : > { %v1578_v58 = vmul.f32 0.2, %v1506_v13  ;;  %v1428_v19 = vadd.f32 %v1327_v47, %v3823_v9  ;;  %vm1542_vm12 = vcmp.ge.f32.partialorder %v1506_v13, 0.0  ;;  %v1613_v49 = vsel %vm1541_vm11, %v1505_v5, %v1577_v15 }
 0x1fc   : > { %v1329_v18 = vpop.permute.xlu1 %1328  ;;  %1356 = vrot.lane.b32.xlu1 %v3951_v56, %s3323_s8 }
 0x1fd   : > { %v1464_v50 = vadd.f32 %v1428_v19, %v3851_v20  ;;  %v1429_v7 = vadd.f32 %v1329_v18, %v3829_v11  ;;  %v1614_v29 = vsel %vm1542_vm12, %v1506_v13, %v1578_v58 }
 0x1fe   : > { %v4087_v44 = vpack.c.bf16 %v1614_v29, %v1613_v49 }
 0x1ff   : > { %v1507_v0 = vadd.f32 %v4033_v2, %v1464_v50  ;;  %v1465_v43 = vadd.f32 %v1429_v7, %v3857_v23 }
 0x200   : > { %1931 = vrot.lane.b32.xlu0 %v4087_v44, %s3323_s8  ;;  %1358 = vrot.lane.b32.xlu1 %v3964_v61, %s3323_s8 }
 0x201   : > { %v1579_v9 = vmul.f32 0.2, %v1507_v0  ;;  %v1508_v55 = vadd.f32 %v4033_v2, %v1465_v43  ;;  %vm1543_vm13 = vcmp.ge.f32.partialorder %v1507_v0, 0.0 }
 0x202   : > { %v1331_v20 = vpop.permute.xlu0 %1330 }
 0x203   : > { %v1580_v11 = vmul.f32 0.2, %v1508_v55  ;;  %v1430_v32 = vadd.f32 %v1331_v20, %v3835_v14  ;;  %vm1544_vm14 = vcmp.ge.f32.partialorder %v1508_v55, 0.0  ;;  %v1615_v5 = vsel %vm1543_vm13, %v1507_v0, %v1579_v9 }
 0x204   : > { %v1333_v8 = vpop.permute.xlu1 %1332  ;;  %1360 = vrot.lane.b32.xlu0 %v3971_v3, %s3323_s8 }
 0x205   : > { %v1466_v23 = vadd.f32 %v1430_v32, %v3863_v26  ;;  %v1431_v17 = vadd.f32 %v1333_v8, %v3841_v28  ;;  %v1616_v10 = vsel %vm1544_vm14, %v1508_v55, %v1580_v11 }
 0x206   : > { %v4101_v12 = vpack.c.bf16 %v1616_v10, %v1615_v5 }
 0x207   : > { %v1509_v15 = vadd.f32 %v4033_v2, %v1466_v23  ;;  %v1467_v13 = vadd.f32 %v1431_v17, %v3869_v27  ;;  %v4131_v23 = vpop.f32.mrb[72].mxu0 }
 0x208   : > { %1933 = vrot.lane.b32.xlu1 %v4101_v12, %s3323_s8  ;;  %1362 = vrot.lane.b32.xlu0 %v3984_v39, %s3323_s8 }
 0x209   : > { %v1581_v14 = vmul.f32 0.2, %v1509_v15  ;;  %v1510_v47 = vadd.f32 %v4033_v2, %v1467_v13  ;;  %vm1545_vm15 = vcmp.ge.f32.partialorder %v1509_v15, 0.0 }
 0x20a   : > { %v1335_v26 = vpop.permute.xlu0 %1334 }
 0x20b   : > { %v1582_v28 = vmul.f32 0.2, %v1510_v47  ;;  %v1432_v58 = vadd.f32 %v1335_v26, %v3847_v16  ;;  %vm1546_vm0 = vcmp.ge.f32.partialorder %v1510_v47, 0.0  ;;  %v1617_v50 = vsel %vm1545_vm15, %v1509_v15, %v1581_v14 }
 0x20c   : > { %v1337_v19 = vpop.permute.xlu1 %1336  ;;  %1364 = vrot.lane.b32.xlu1 %v3991_v48, %s3323_s8 }
 0x20d   : > { %v1468_v27 = vadd.f32 %v1432_v58, %v3875_v31  ;;  %v1433_v18 = vadd.f32 %v1337_v19, %v3853_v22  ;;  %v1618_v7 = vsel %vm1546_vm0, %v1510_v47, %v1582_v28 }
 0x20e   : > { %v4115_v49 = vpack.c.bf16 %v1618_v7, %v1617_v50 }
 0x20f   : > { %v1511_v29 = vadd.f32 %v4033_v2, %v1468_v27  ;;  %v1469_v0 = vadd.f32 %v1433_v18, %v3881_v33 }
 0x210   : > { %1935 = vrot.lane.b32.xlu0 %v4115_v49, %s3323_s8  ;;  %1366 = vrot.lane.b32.xlu1 %v4004_v59, %s3323_s8 }
 0x211   : > { %v1583_v16 = vmul.f32 0.2, %v1511_v29  ;;  %v1512_v43 = vadd.f32 %v4033_v2, %v1469_v0  ;;  %vm1547_vm1 = vcmp.ge.f32.partialorder %v1511_v29, 0.0 }
 0x212   : > { %v1339_v31 = vpop.permute.xlu0 %1338 }
 0x213   : > { %v1584_v22 = vmul.f32 0.2, %v1512_v43  ;;  %v1434_v9 = vadd.f32 %v1339_v31, %v3859_v25  ;;  %vm1548_vm4 = vcmp.ge.f32.partialorder %v1512_v43, 0.0  ;;  %v1619_v11 = vsel %vm1547_vm1, %v1511_v29, %v1583_v16 }
 0x214   : > { %v1341_v55 = vpop.permute.xlu1 %1340  ;;  %1368 = vrot.lane.b32.xlu0 %v4011_v4, %s3323_s8 }
 0x215   : > { %v1470_v33 = vadd.f32 %v1434_v9, %v3887_v35  ;;  %v1435_v20 = vadd.f32 %v1341_v55, %v3865_v57  ;;  %v1620_v32 = vsel %vm1548_vm4, %v1512_v43, %v1584_v22  ;;  %v4894_v55 = vld [vmem:[#allocation10_spill] sm:$0xff] }
 0x216   : > { %v4129_v8 = vpack.c.bf16 %v1620_v32, %v1619_v11  ;;  %v4895_v11 = vld [vmem:[#allocation7_spill] sm:$0xff] }
 0x217   : > { %v1513_v17 = vadd.f32 %v4033_v2, %v1470_v33  ;;  %v1471_v5 = vadd.f32 %v1435_v20, %v3893_v37  ;;  %v4143_v37 = vpop.f32.mrb[73].mxu0 }
 0x218   : > { %1937 = vrot.lane.b32.xlu1 %v4129_v8, %s3323_s8  ;;  %1370 = vrot.lane.b32.xlu0 %v4021_v53, %s3323_s8  ;;  %v4147_v58 = vpop.f32.mrb[74].mxu0 }
 0x219   : > { %v1585_v25 = vmul.f32 0.2, %v1513_v17  ;;  %v1514_v35 = vadd.f32 %v4033_v2, %v1471_v5  ;;  %vm1549_vm5 = vcmp.ge.f32.partialorder %v1513_v17, 0.0  ;;  %v4151_v27 = vpop.f32.mrb[75].mxu0 }
 0x21a   : > { %v1343_v57 = vpop.permute.xlu0 %1342 }
 0x21b   : > { %v1586_v10 = vmul.f32 0.2, %v1514_v35  ;;  %v1436_v15 = vadd.f32 %v1343_v57, %v3871_v30  ;;  %vm1550_vm7 = vcmp.ge.f32.partialorder %v1514_v35, 0.0  ;;  %v1621_v26 = vsel %vm1549_vm5, %v1513_v17, %v1585_v25  ;;  %v4896_v17 = vld [vmem:[#allocation11_spill] sm:$0xff] }
 0x21c   : > { %v1345_v13 = vpop.permute.xlu1 %1344  ;;  %1372 = vrot.lane.b32.xlu1 %v4025_v6, %s3323_s8 }
 0x21d   : > { %v1472_v14 = vadd.f32 %v1436_v15, %v3899_v38  ;;  %v1437_v47 = vadd.f32 %v1345_v13, %v3877_v21  ;;  %v1622_v28 = vsel %vm1550_vm7, %v1514_v35, %v1586_v10  ;;  %v1271_v10 = vpop.f32.mrb[76].mxu0 }
 0x21e   : > { %v4149_v19 = vpack.c.bf16 %v1622_v28, %v1621_v26  ;;  %v4182_v15 = vpop.f32.mrb[77].mxu0  ;;  %v1683_v28 = vshrl.u32 %v4068_v24, 16 }
 0x21f   : > { %v1515_v30 = vadd.f32 %v4033_v2, %v1472_v14  ;;  %v1473_v18 = vadd.f32 %v1437_v47, %v3911_v41  ;;  %v1274_v13 = vpop.f32.mrb[78].mxu0  ;;  %v1686_v47 = vshll.u32 %v4068_v24, 16 }
 0x220   : > { %1939 = vrot.lane.b32.xlu0 %v4149_v19, %s3323_s8  ;;  %1374 = vrot.lane.b32.xlu1 %v4039_v63, %s3323_s8  ;;  %v4184_v14 = vpop.f32.mrb[79].mxu0 }
 0x221   : > { %v1587_v38 = vmul.f32 0.2, %v1515_v30  ;;  %v1516_v21 = vadd.f32 %v4033_v2, %v1473_v18  ;;  %vm1551_vm8 = vcmp.ge.f32.partialorder %v1515_v30, 0.0  ;;  %v1839_v26 = vrot.slane %v1686_v47, 1 }
 0x222   : > { %v1347_v50 = vpop.permute.xlu0 %1346 }
 0x223   : > { %v1588_v7 = vmul.f32 0.2, %v1516_v21  ;;  %v1438_v29 = vadd.f32 %v1347_v50, %v3883_v34  ;;  %vm1552_vm9 = vcmp.ge.f32.partialorder %v1516_v21, 0.0  ;;  %v1623_v43 = vsel %vm1551_vm8, %v1515_v30, %v1587_v38 }
 0x224   : > { %v1349_v0 = vpop.permute.xlu1 %1348  ;;  %1376 = vrot.lane.b32.xlu0 %v4044_v46, %s3323_s8  ;;  %v1693_v30 = vshll.u32 %v4087_v44, 16  ;;  %v1840_v18 = vor.u32 %v1839_v26, %v1683_v28  ;;  %v1819_v50 = vsel %vm3622_vm6, 0, %v4070_v40  ;;  %v1700_v40 = vshll.u32 %v4101_v12, 16 }
 0x225   : > { %v1474_v41 = vadd.f32 %v1438_v29, %v3926_v45  ;;  %v1439_v16 = vadd.f32 %v1349_v0, %v3889_v36  ;;  %v1624_v31 = vsel %vm1552_vm9, %v1516_v21, %v1588_v7  ;;  %v1685_v7 = vrot.slane %v1683_v28, 7  ;;  %v4901_v28 = vld [vmem:[#allocation13_spill] sm:$0xff] }
 0x226   : > { %v4165_v22 = vpack.c.bf16 %v1624_v31, %v1623_v43  ;;  %v1892_v0 = vsel %vm3533_vm3, %v1840_v18, 0  ;;  %v1690_v43 = vshrl.u32 %v4087_v44, 16 }
 0x227   : > { %v1517_v9 = vadd.f32 %v4033_v2, %v1474_v41  ;;  %v1475_v33 = vadd.f32 %v1439_v16, %v4894_v55  ;;  %v1841_v41 = vrot.slane %v1693_v30, 1  ;;  %v1688_v24 = vor.u32 %v1686_v47, %v1685_v7 }
 0x228   : > { %1941 = vrot.lane.b32.xlu1 %v4165_v22, %s3323_s8  ;;  %1378 = vrot.lane.b32.xlu0 %v4053_v60, %s3323_s8  ;;  %v1843_v47 = vrot.slane %v1700_v40, 1  ;;  %v1697_v7 = vshrl.u32 %v4101_v12, 16 }
 0x229   : > { %v1589_v34 = vmul.f32 0.2, %v1517_v9  ;;  %v1518_v20 = vadd.f32 %v4033_v2, %v1475_v33  ;;  %vm1553_vm10 = vcmp.ge.f32.partialorder %v1517_v9, 0.0 }
 0x22a   : > { %v1351_v45 = vpop.permute.xlu1 %1350 }
 0x22b   : > { %v1590_v36 = vmul.f32 0.2, %v1518_v20  ;;  %v1440_v32 = vadd.f32 %v1351_v45, %v4895_v11  ;;  %vm1554_vm11 = vcmp.ge.f32.partialorder %v1518_v20, 0.0  ;;  %v1625_v25 = vsel %vm1553_vm10, %v1517_v9, %v1589_v34  ;;  %v4898_v9 = vld [vmem:[#allocation8_spill] sm:$0xff] }
 0x22c   : > { %1380 = vrot.lane.b32.xlu1 %v4058_v54, %s3323_s8  ;;  %v1842_v34 = vor.u32 %v1841_v41, %v1690_v43  ;;  %v1820_v11 = vsel %vm3622_vm6, 0, %v1688_v24 }
 0x22d   : > { %v1476_v5 = vadd.f32 %v1440_v32, %v4896_v17  ;;  %v1626_v35 = vsel %vm1554_vm11, %v1518_v20, %v1590_v36  ;;  %v4899_v20 = vld [vmem:[#allocation12_spill] sm:$0xff]  ;;  %v1692_v32 = vrot.slane %v1690_v43, 7  ;;  %v1707_v43 = vshll.u32 %v4115_v49, 16 }
 0x22e   : > { %v4178_v57 = vpack.c.bf16 %v1626_v35, %v1625_v25  ;;  %v4900_v35 = vld [vmem:[#allocation9_spill] sm:$0xff]  ;;  %v1893_v13 = vsel %vm3533_vm3, %v1842_v34, 0  ;;  %v1844_v34 = vor.u32 %v1843_v47, %v1697_v7 }
 0x22f   : > { %v1519_v31 = vadd.f32 %v4033_v2, %v1476_v5 }
 0x230   : > { %1943 = vrot.lane.b32.xlu0 %v4178_v57, %s3323_s8 }
 0x231   : > { %v1591_v17 = vmul.f32 0.2, %v1519_v31  ;;  %vm1555_vm12 = vcmp.ge.f32.partialorder %v1519_v31, 0.0 }
 0x264   : > { %v1928_v38 = vpop.permute.xlu0 %1927 }
 0x265   : > { %v1965_v29 = vsel %vm766_vm2, %v1819_v50, %v1928_v38  ;;  %v1695_v50 = vor.u32 %v1693_v30, %v1692_v32 }
 0x266   : > { %2266 = vmatmul.mubr.bf16.vlgmr.msra.gmra.mrb[0].mxu1 %v1965_v29 }
 0x267   : > { %3054 = vmatprep.mubr.msk.bf16.mxu1 %vm766_vm2, %v1892_v0  ;;  %v4902_v0 = vld [vmem:[#allocation14_spill] sm:$0xff]  ;;  %v1821_v12 = vsel %vm3622_vm6, 0, %v1695_v50 }
 0x268   : > { %v1353_v16 = vpop.permute.xlu0 %1352 }
 0x269   : > { %v1441_v55 = vadd.f32 %v1353_v16, %v4898_v9  ;;  %v1627_v16 = vsel %vm1555_vm12, %v1519_v31, %v1591_v17  ;;  %v1699_v31 = vrot.slane %v1697_v7, 7  ;;  %v4904_v7 = vld [vmem:[#allocation16_spill] sm:$0xff] }
 0x26a   : > { %v1930_v33 = vpop.permute.xlu1 %1929 }
 0x26b   : > { %v1477_v45 = vadd.f32 %v1441_v55, %v4899_v20  ;;  %v1969_v5 = vsel %vm766_vm2, %v1820_v11, %v1930_v33  ;;  %v4903_v11 = vld [vmem:[#allocation15_spill] sm:$0xff] }
 0x26c   : > { %v1355_v36 = vpop.permute.xlu0 %1354 }
 0x26d   : > { %v1520_v25 = vadd.f32 %v4033_v2, %v1477_v45  ;;  %v1442_v44 = vadd.f32 %v1355_v36, %v4900_v35  ;;  %v1894_v35 = vsel %vm3533_vm3, %v1844_v34, 0 }
 0x26e   : > { %2274 = vmatmul.mubr.bf16.gmra.mrb[4].mxu1 %v1969_v5  ;;  %v1357_v10 = vpop.permute.xlu1 %1356 }
 0x26f   : > { %v1592_v26 = vmul.f32 0.2, %v1520_v25  ;;  %v1478_v18 = vadd.f32 %v1442_v44, %v4901_v28  ;;  %v1443_v38 = vadd.f32 %v1357_v10, %v3931_v1  ;;  %3055 = vmatprep.mubr.msk.bf16.mxu1 %vm766_vm2, %v1893_v13  ;;  %vm1556_vm13 = vcmp.ge.f32.partialorder %v1520_v25, 0.0 }
 0x270   : > { %v1845_v44 = vrot.slane %v1707_v43, 1 }
 0x271   : > { %v1521_v29 = vadd.f32 %v4033_v2, %v1478_v18  ;;  %v1479_v41 = vadd.f32 %v1443_v38, %v4902_v0  ;;  %v1628_v24 = vsel %vm1556_vm13, %v1520_v25, %v1592_v26  ;;  %v1702_v18 = vor.u32 %v1700_v40, %v1699_v31 }
 0x272   : > { %v1932_v9 = vpop.permute.xlu0 %1931  ;;  %v1359_v55 = vpop.permute.xlu1 %1358  ;;  %v4215_v33 = vpack.c.bf16 %v1628_v24, %v1627_v16  ;;  %v1704_v38 = vshrl.u32 %v4115_v49, 16 }
 0x273   : > { %v1593_v1 = vmul.f32 0.2, %v1521_v29  ;;  %v1522_v20 = vadd.f32 %v4033_v2, %v1479_v41  ;;  %v1444_v30 = vadd.f32 %v1359_v55, %v3944_v42  ;;  %vm1557_vm14 = vcmp.ge.f32.partialorder %v1521_v29, 0.0 }
 0x274   : > { %1945 = vrot.lane.b32.xlu1 %v4215_v33, %s3323_s8  ;;  %v1739_v45 = vshrl.u32 %v4215_v33, 16  ;;  %v1973_v17 = vsel %vm766_vm2, %v1821_v12, %v1932_v9  ;;  %v1742_v25 = vshll.u32 %v4215_v33, 16  ;;  %v1714_v41 = vshll.u32 %v4129_v8, 16 }
 0x275   : > { %v1594_v36 = vmul.f32 0.2, %v1522_v20  ;;  %v1480_v32 = vadd.f32 %v1444_v30, %v4903_v11  ;;  %vm1558_vm15 = vcmp.ge.f32.partialorder %v1522_v20, 0.0  ;;  %v1629_v47 = vsel %vm1557_vm14, %v1521_v29, %v1593_v1  ;;  %v4905_v1 = vld [vmem:[#allocation17_spill] sm:$0xff] }
 0x276   : > { %2282 = vmatmul.mubr.bf16.gmra.mrb[8].mxu1 %v1973_v17  ;;  %v1361_v42 = vpop.permute.xlu0 %1360  ;;  %v1741_v5 = vrot.slane %v1739_v45, 7  ;;  %v1846_v29 = vor.u32 %v1845_v44, %v1704_v38  ;;  %v1822_v49 = vsel %vm3622_vm6, 0, %v1702_v18  ;;  %v1706_v55 = vrot.slane %v1704_v38, 7 }
 0x277   : > { %v1523_v10 = vadd.f32 %v4033_v2, %v1480_v32  ;;  %v1445_v13 = vadd.f32 %v1361_v42, %v3951_v56  ;;  %3056 = vmatprep.mubr.msk.bf16.mxu1 %vm766_vm2, %v1894_v35  ;;  %v1630_v26 = vsel %vm1558_vm15, %v1522_v20, %v1594_v36  ;;  %v1847_v36 = vrot.slane %v1714_v41, 1 }
 0x278   : > { %v4235_v28 = vpack.c.bf16 %v1630_v26, %v1629_v47  ;;  %v4240_v50 = vor.u32 %v1742_v25, %v1741_v5  ;;  %v1895_v31 = vsel %vm3533_vm3, %v1846_v29, 0  ;;  %v1709_v35 = vor.u32 %v1707_v43, %v1706_v55  ;;  %v4906_v5 = vld [vmem:[#allocation18_spill] sm:$0xff] }
 0x279   : > { %v1481_v0 = vadd.f32 %v1445_v13, %v4904_v7  ;;  %v1595_v24 = vmul.f32 0.2, %v1523_v10  ;;  %vm1559_vm0 = vcmp.ge.f32.partialorder %v1523_v10, 0.0  ;;  %v1711_v44 = vshrl.u32 %v4129_v8, 16 }
 0x27a   : > { %v1934_v16 = vpop.permute.xlu1 %1933  ;;  %v1363_v56 = vpop.permute.xlu0 %1362  ;;  %1947 = vrot.lane.b32.xlu0 %v4235_v28, %s3323_s8  ;;  %v1721_v47 = vshll.u32 %v4149_v19, 16  ;;  %v1823_v43 = vsel %vm3622_vm6, 0, %v1709_v35 }
 0x27b   : > { %v1524_v9 = vadd.f32 %v4033_v2, %v1481_v0  ;;  %v1446_v40 = vadd.f32 %v1363_v56, %v3964_v61  ;;  %v1977_v30 = vsel %vm766_vm2, %v1822_v49, %v1934_v16  ;;  %v1631_v32 = vsel %vm1559_vm0, %v1523_v10, %v1595_v24  ;;  %v4907_v16 = vld [vmem:[#allocation19_spill] sm:$0xff] }
 0x27c   : > { %v1848_v38 = vor.u32 %v1847_v36, %v1711_v44  ;;  %v1713_v8 = vrot.slane %v1711_v44, 7  ;;  %v1728_v36 = vshll.u32 %v4165_v22, 16 }
 0x27d   : > { %v1596_v34 = vmul.f32 0.2, %v1524_v9  ;;  %v1482_v20 = vadd.f32 %v1446_v40, %v4905_v1  ;;  %vm1560_vm1 = vcmp.ge.f32.partialorder %v1524_v9, 0.0  ;;  %v1849_v40 = vrot.slane %v1721_v47, 1 }
 0x27e   : > { %2292 = vmatmul.mubr.bf16.gmra.mrb[12].mxu1 %v1977_v30  ;;  %v1365_v12 = vpop.permute.xlu1 %1364  ;;  %v1718_v30 = vshrl.u32 %v4149_v19, 16 }
 0x27f   : > { %v1525_v11 = vadd.f32 %v4033_v2, %v1482_v20  ;;  %v1447_v61 = vadd.f32 %v1365_v12, %v3971_v3  ;;  %3057 = vmatprep.mubr.msk.bf16.mxu1 %vm766_vm2, %v1895_v31  ;;  %v1632_v17 = vsel %vm1560_vm1, %v1524_v9, %v1596_v34  ;;  %v1896_v9 = vsel %vm3533_vm3, %v1848_v38, 0  ;;  %v4908_v12 = vld [vmem:[#allocation20_spill] sm:$0xff] }
 0x280   : > { %v4257_v42 = vpack.c.bf16 %v1632_v17, %v1631_v32  ;;  %v1716_v20 = vor.u32 %v1714_v41, %v1713_v8  ;;  %v1850_v17 = vor.u32 %v1849_v40, %v1718_v30  ;;  %v1720_v19 = vrot.slane %v1718_v30, 7 }
 0x281   : > { %v1483_v13 = vadd.f32 %v1447_v61, %v4906_v5  ;;  %v1597_v3 = vmul.f32 0.2, %v1525_v11  ;;  %vm1561_vm4 = vcmp.ge.f32.partialorder %v1525_v11, 0.0  ;;  %v4909_v5 = vld [vmem:[#allocation21_spill] sm:$0xff] }
 0x282   : > { %v1936_v26 = vpop.permute.xlu0 %1935  ;;  %v1367_v18 = vpop.permute.xlu1 %1366  ;;  %1949 = vrot.lane.b32.xlu1 %v4257_v42, %s3323_s8  ;;  %v1824_v41 = vsel %vm3622_vm6, 0, %v1716_v20  ;;  %v1897_v38 = vsel %vm3533_vm3, %v1850_v17, 0 }
 0x283   : > { %v1526_v7 = vadd.f32 %v4033_v2, %v1483_v13  ;;  %v1448_v10 = vadd.f32 %v1367_v18, %v3984_v39  ;;  %v1981_v29 = vsel %vm766_vm2, %v1823_v43, %v1936_v26  ;;  %v1633_v55 = vsel %vm1561_vm4, %v1525_v11, %v1597_v3 }
 0x284   : > { %v1851_v3 = vrot.slane %v1728_v36, 1 }
 0x285   : > { %v1598_v0 = vmul.f32 0.2, %v1526_v7  ;;  %v1484_v56 = vadd.f32 %v1448_v10, %v4907_v16  ;;  %vm1562_vm5 = vcmp.ge.f32.partialorder %v1526_v7, 0.0  ;;  %v1725_v16 = vshrl.u32 %v4165_v22, 16 }
 0x286   : > { %2302 = vmatmul.mubr.bf16.gmra.mrb[16].mxu1 %v1981_v29  ;;  %v1369_v24 = vpop.permute.xlu0 %1368 }
 0x287   : > { %v1527_v49 = vadd.f32 %v4033_v2, %v1484_v56  ;;  %v1449_v39 = vadd.f32 %v1369_v24, %v3991_v48  ;;  %3058 = vmatprep.mubr.msk.bf16.mxu1 %vm766_vm2, %v1896_v9  ;;  %v1634_v34 = vsel %vm1562_vm5, %v1526_v7, %v1598_v0  ;;  %v1723_v0 = vor.u32 %v1721_v47, %v1720_v19  ;;  %v4910_v56 = vld [vmem:[#allocation22_spill] sm:$0xff] }
 0x288   : > { %v4275_v1 = vpack.c.bf16 %v1634_v34, %v1633_v55  ;;  %v1735_v24 = vshll.u32 %v4178_v57, 16  ;;  %v1727_v22 = vrot.slane %v1725_v16, 7 }
 0x289   : > { %v1485_v31 = vadd.f32 %v1449_v39, %v4908_v12  ;;  %v1599_v48 = vmul.f32 0.2, %v1527_v49  ;;  %vm1563_vm7 = vcmp.ge.f32.partialorder %v1527_v49, 0.0  ;;  %v1852_v39 = vor.u32 %v1851_v3, %v1725_v16 }
 0x28a   : > { %v1938_v61 = vpop.permute.xlu1 %1937  ;;  %v1371_v32 = vpop.permute.xlu0 %1370  ;;  %1951 = vrot.lane.b32.xlu0 %v4275_v1, %s3323_s8  ;;  %v1825_v47 = vsel %vm3622_vm6, 0, %v1723_v0 }
 0x28b   : > { %v1528_v35 = vadd.f32 %v4033_v2, %v1485_v31  ;;  %v1450_v11 = vadd.f32 %v1371_v32, %v4004_v59  ;;  %v1985_v26 = vsel %vm766_vm2, %v1824_v41, %v1938_v61  ;;  %v1635_v10 = vsel %vm1563_vm7, %v1527_v49, %v1599_v48 }
 0x28c   : > { %v1898_v31 = vsel %vm3533_vm3, %v1852_v39, 0  ;;  %v1749_v39 = vshll.u32 %v4235_v28, 16 }
 0x28d   : > { %v1600_v44 = vmul.f32 0.2, %v1528_v35  ;;  %v1486_v13 = vadd.f32 %v1450_v11, %v4909_v5  ;;  %vm1564_vm8 = vcmp.ge.f32.partialorder %v1528_v35, 0.0  ;;  %v1732_v11 = vshrl.u32 %v4178_v57, 16 }
 0x28e   : > { %2312 = vmatmul.mubr.bf16.gmra.mrb[20].mxu1 %v1985_v26  ;;  %v1373_v18 = vpop.permute.xlu1 %1372 }
 0x28f   : > { %v1529_v7 = vadd.f32 %v4033_v2, %v1486_v13  ;;  %v1451_v59 = vadd.f32 %v1373_v18, %v4011_v4  ;;  %3059 = vmatprep.mubr.msk.bf16.mxu1 %vm766_vm2, %v1897_v38  ;;  %v1636_v43 = vsel %vm1564_vm8, %v1528_v35, %v1600_v44  ;;  %v1730_v35 = vor.u32 %v1728_v36, %v1727_v22 }
 0x290   : > { %v4293_v8 = vpack.c.bf16 %v1636_v43, %v1635_v10  ;;  %v1734_v36 = vrot.slane %v1732_v11, 7 }
 0x291   : > { %v1487_v29 = vadd.f32 %v1451_v59, %v4910_v56  ;;  %v1601_v4 = vmul.f32 0.2, %v1529_v7  ;;  %vm1565_vm9 = vcmp.ge.f32.partialorder %v1529_v7, 0.0  ;;  %v1826_v26 = vsel %vm3622_vm6, 0, %v1730_v35 }
 0x292   : > { %v1940_v9 = vpop.permute.xlu0 %1939  ;;  %v1375_v40 = vpop.permute.xlu1 %1374  ;;  %1953 = vrot.lane.b32.xlu1 %v4293_v8, %s3323_s8  ;;  %v1737_v0 = vor.u32 %v1735_v24, %v1734_v36 }
 0x293   : > { %v1530_v55 = vadd.f32 %v4033_v2, %v1487_v29  ;;  %v1452_v49 = vadd.f32 %v1375_v40, %v4021_v53  ;;  %v1989_v30 = vsel %vm766_vm2, %v1825_v47, %v1940_v9  ;;  %v1853_v53 = vrot.slane %v1735_v24, 1 }
 0x294   : > { %v1637_v17 = vsel %vm1565_vm9, %v1529_v7, %v1601_v4  ;;  %v1857_v4 = vrot.slane %v1749_v39, 1 }
 0x295   : > { %v1602_v34 = vmul.f32 0.2, %v1530_v55  ;;  %v1488_v20 = vadd.f32 %v1452_v49, %v4055_v51  ;;  %vm1566_vm10 = vcmp.ge.f32.partialorder %v1530_v55, 0.0  ;;  %v1854_v44 = vor.u32 %v1853_v53, %v1732_v11 }
 0x296   : > { %2322 = vmatmul.mubr.bf16.gmra.mrb[24].mxu1 %v1989_v30  ;;  %v1377_v12 = vpop.permute.xlu0 %1376  ;;  %1382 = vrot.lane.b32.xlu1 %v4131_v23, %s3323_s8  ;;  %v1756_v49 = vshll.u32 %v4257_v42, 16 }
 0x297   : > { %v1531_v61 = vadd.f32 %v4033_v2, %v1488_v20  ;;  %v1453_v32 = vadd.f32 %v1377_v12, %v4025_v6  ;;  %3060 = vmatprep.mubr.msk.bf16.mxu1 %vm766_vm2, %v1898_v31  ;;  %v1638_v51 = vsel %vm1566_vm10, %v1530_v55, %v1602_v34  ;;  %v1899_v3 = vsel %vm3533_vm3, %v1854_v44, 0 }
 0x298   : > { %v4313_v48 = vpack.c.bf16 %v1638_v51, %v1637_v17  ;;  %v1746_v55 = vshrl.u32 %v4235_v28, 16  ;;  %v1828_v34 = vsel %vm3622_vm6, 0, %v4240_v50  ;;  %v1859_v31 = vrot.slane %v1756_v49, 1 }
 0x299   : > { %v1489_v41 = vadd.f32 %v1453_v32, %v4061_v62  ;;  %v1603_v5 = vmul.f32 0.2, %v1531_v61  ;;  %vm1567_vm11 = vcmp.ge.f32.partialorder %v1531_v61, 0.0  ;;  %v1753_v28 = vshrl.u32 %v4257_v42, 16 }
 0x29a   : > { %v1942_v23 = vpop.permute.xlu1 %1941  ;;  %1955 = vrot.lane.b32.xlu0 %v4313_v48, %s3323_s8  ;;  %v1379_v19 = vpop.permute.xlu0 %1378  ;;  %v1858_v47 = vor.u32 %v1857_v4, %v1746_v55  ;;  %v1748_v20 = vrot.slane %v1746_v55, 7  ;;  %v1760_v42 = vshrl.u32 %v4275_v1, 16 }
 0x29b   : > { %v1532_v6 = vadd.f32 %v4033_v2, %v1489_v41  ;;  %v1454_v13 = vadd.f32 %v1379_v19, %v4039_v63  ;;  %v1993_v62 = vsel %vm766_vm2, %v1826_v26, %v1942_v23  ;;  %v1855_v63 = vrot.slane %v1742_v25, 1 }
 0x29c   : > { %v1901_v12 = vsel %vm3533_vm3, %v1858_v47, 0  ;;  %v1751_v53 = vor.u32 %v1749_v39, %v1748_v20  ;;  %v1860_v17 = vor.u32 %v1859_v31, %v1753_v28  ;;  %v1755_v51 = vrot.slane %v1753_v28, 7 }
 0x29d   : > { %v1604_v18 = vmul.f32 0.2, %v1532_v6  ;;  %v1490_v57 = vadd.f32 %v1454_v13, %v4143_v37  ;;  %vm1568_vm12 = vcmp.ge.f32.partialorder %v1532_v6, 0.0  ;;  %v1639_v37 = vsel %vm1567_vm11, %v1531_v61, %v1603_v5 }
 0x29e   : > { %2332 = vmatmul.mubr.bf16.gmra.mrb[28].mxu1 %v1993_v62  ;;  %v1381_v38 = vpop.permute.xlu1 %1380  ;;  %1384 = vrot.lane.b32.xlu0 %v4147_v58, %s3323_s8  ;;  %v1856_v25 = vor.u32 %v1855_v63, %v1739_v45  ;;  %v1763_v61 = vshll.u32 %v4275_v1, 16  ;;  %v1829_v50 = vsel %vm3622_vm6, 0, %v1751_v53  ;;  %v1902_v11 = vsel %vm3533_vm3, %v1860_v17, 0 }
 0x29f   : > { %v1533_v7 = vadd.f32 %v4033_v2, %v1490_v57  ;;  %v1455_v59 = vadd.f32 %v1381_v38, %v4044_v46  ;;  %3061 = vmatprep.mubr.msk.bf16.mxu1 %vm766_vm2, %v1899_v3  ;;  %v1640_v10 = vsel %vm1568_vm12, %v1532_v6, %v1604_v18  ;;  %v1827_v46 = vsel %vm3622_vm6, 0, %v1737_v0 }
 0x2a0   : > { %v4334_v43 = vpack.c.bf16 %v1640_v10, %v1639_v37  ;;  %v1861_v41 = vrot.slane %v1763_v61, 1  ;;  %v1758_v23 = vor.u32 %v1756_v49, %v1755_v51  ;;  %v1770_v19 = vshll.u32 %v4293_v8, 16 }
 0x2a1   : > { %v1491_v16 = vadd.f32 %v1455_v59, %v4151_v27  ;;  %v1605_v56 = vmul.f32 0.2, %v1533_v7  ;;  %vm1569_vm13 = vcmp.ge.f32.partialorder %v1533_v7, 0.0  ;;  %v1900_v27 = vsel %vm3533_vm3, %v1856_v25, 0 }
 0x2a2   : > { %v1944_v58 = vpop.permute.xlu0 %1943  ;;  %1957 = vrot.lane.b32.xlu1 %v4334_v43, %s3323_s8  ;;  %v1862_v5 = vor.u32 %v1861_v41, %v1760_v42  ;;  %v1830_v6 = vsel %vm3622_vm6, 0, %v1758_v23  ;;  %v1762_v13 = vrot.slane %v1760_v42, 7  ;;  %v1863_v18 = vrot.slane %v1770_v19, 1 }
 0x2a3   : > { %v1534_v29 = vadd.f32 %v4033_v2, %v1491_v16  ;;  %v1997_v40 = vsel %vm766_vm2, %v1827_v46, %v1944_v58  ;;  %v1641_v24 = vsel %vm1569_vm13, %v1533_v7, %v1605_v56  ;;  %v1767_v1 = vshrl.u32 %v4293_v8, 16 }
 0x2a4   : > { %v1903_v36 = vsel %vm3533_vm3, %v1862_v5, 0  ;;  %v1765_v57 = vor.u32 %v1763_v61, %v1762_v13  ;;  %v1777_v62 = vshll.u32 %v4313_v48, 16  ;;  %v1774_v8 = vshrl.u32 %v4313_v48, 16 }
 0x2a5   : > { %v1606_v9 = vmul.f32 0.2, %v1534_v29  ;;  %vm1570_vm14 = vcmp.ge.f32.partialorder %v1534_v29, 0.0  ;;  %v1864_v3 = vor.u32 %v1863_v18, %v1767_v1  ;;  %v1769_v7 = vrot.slane %v1767_v1, 7 }
 0x2a6   : > { %2342 = vmatmul.mubr.bf16.gmra.mrb[32].mxu1 %v1997_v40  ;;  %v1831_v63 = vsel %vm3622_vm6, 0, %v1765_v57  ;;  %v1865_v10 = vrot.slane %v1777_v62, 1  ;;  %v1784_v16 = vshll.u32 %v4334_v43, 16 }
 0x2a7   : > { %3062 = vmatprep.mubr.msk.bf16.mxu1 %vm766_vm2, %v1900_v27  ;;  %v1642_v33 = vsel %vm1570_vm14, %v1534_v29, %v1606_v9  ;;  %v1904_v37 = vsel %vm3533_vm3, %v1864_v3, 0  ;;  %v1772_v0 = vor.u32 %v1770_v19, %v1769_v7  ;;  %v1776_v29 = vrot.slane %v1774_v8, 7 }
 0x2a8   : > { %v4348_v45 = vpack.c.bf16 %v1642_v33, %v1641_v24  ;;  %v1866_v25 = vor.u32 %v1865_v10, %v1774_v8  ;;  %v1867_v27 = vrot.slane %v1784_v16, 1  ;;  %v1781_v33 = vshrl.u32 %v4334_v43, 16 }
 0x2a9   : > { %v1832_v56 = vsel %vm3622_vm6, 0, %v1772_v0  ;;  %v1779_v48 = vor.u32 %v1777_v62, %v1776_v29 }
 0x2aa   : > { %1959 = vrot.lane.b32.xlu0 %v4348_v45, %s3323_s8  ;;  %v1905_v40 = vsel %vm3533_vm3, %v1866_v25, 0  ;;  %v1791_v4 = vshll.u32 %v4348_v45, 16  ;;  %v1868_v49 = vor.u32 %v1867_v27, %v1781_v33  ;;  %v1788_v31 = vshrl.u32 %v4348_v45, 16 }
 0x2ab   : > { %v1833_v47 = vsel %vm3622_vm6, 0, %v1779_v48 }
 0x2ac   : > { %v1869_v43 = vrot.slane %v1791_v4, 1  ;;  %v1790_v51 = vrot.slane %v1788_v31, 7 }
 0x2ae   : > { %v1793_v42 = vor.u32 %v1791_v4, %v1790_v51 }
 0x2b0   : > { %v1835_v5 = vsel %vm3622_vm6, 0, %v1793_v42 }
 0x2e6   : > { %v1946_v22 = vpop.permute.xlu1 %1945 }
 0x2e7   : > { %v2001_v30 = vsel %vm766_vm2, %v1828_v34, %v1946_v22  ;;  %v1783_v22 = vrot.slane %v1781_v33, 7 }
 0x2e8   : > { %2352 = vmatmul.mubr.bf16.gmra.mrb[36].mxu1 %v2001_v30  ;;  %v1906_v30 = vsel %vm3533_vm3, %v1868_v49, 0 }
 0x2e9   : > { %3063 = vmatprep.mubr.msk.bf16.mxu1 %vm766_vm2, %v1901_v12  ;;  %v1786_v12 = vor.u32 %v1784_v16, %v1783_v22 }
 0x2ec   : > { %v1948_v32 = vpop.permute.xlu0 %1947 }
 0x2ed   : > { %v2005_v35 = vsel %vm766_vm2, %v1829_v50, %v1948_v32  ;;  %v1870_v32 = vor.u32 %v1869_v43, %v1788_v31  ;;  %v1834_v50 = vsel %vm3622_vm6, 0, %v1786_v12 }
 0x2ef   : > { %v1907_v45 = vsel %vm3533_vm3, %v1870_v32, 0 }
 0x2f0   : > { %2362 = vmatmul.mubr.bf16.gmra.mrb[40].mxu1 %v2005_v35 }
 0x2f1   : > { %3064 = vmatprep.mubr.msk.bf16.mxu1 %vm766_vm2, %v1902_v11 }
 0x2f4   : > { %v1950_v44 = vpop.permute.xlu1 %1949 }
 0x2f5   : > { %v2009_v26 = vsel %vm766_vm2, %v1830_v6, %v1950_v44 }
 0x2f8   : > { %2372 = vmatmul.mubr.bf16.gmra.mrb[44].mxu1 %v2009_v26 }
 0x2f9   : > { %3065 = vmatprep.mubr.msk.bf16.mxu1 %vm766_vm2, %v1903_v36 }
 0x2fc   : > { %v1952_v38 = vpop.permute.xlu0 %1951 }
 0x2fd   : > { %v2013_v59 = vsel %vm766_vm2, %v1831_v63, %v1952_v38 }
 0x300   : > { %2382 = vmatmul.mubr.bf16.gmra.mrb[48].mxu1 %v2013_v59 }
 0x301   : > { %3066 = vmatprep.mubr.msk.bf16.mxu1 %vm766_vm2, %v1904_v37 }
 0x304   : > { %v1954_v58 = vpop.permute.xlu1 %1953 }
 0x305   : > { %v2017_v46 = vsel %vm766_vm2, %v1832_v56, %v1954_v58 }
 0x308   : > { %2392 = vmatmul.mubr.bf16.gmra.mrb[52].mxu1 %v2017_v46  ;;  %v1383_v9 = vpop.permute.xlu1 %1382 }
 0x309   : > { %v1456_v24 = vadd.f32 %v1383_v9, %v4053_v60  ;;  %3067 = vmatprep.mubr.msk.bf16.mxu1 %vm766_vm2, %v1905_v40 }
 0x30b   : > { %v1492_v39 = vadd.f32 %v1456_v24, %v4182_v15 }
 0x30c   : > { %v1956_v55 = vpop.permute.xlu0 %1955 }
 0x30d   : > { %v1535_v34 = vadd.f32 %v4033_v2, %v1492_v39  ;;  %v2021_v20 = vsel %vm766_vm2, %v1833_v47, %v1956_v55 }
 0x30f   : > { %v1607_v53 = vmul.f32 0.2, %v1535_v34  ;;  %vm1571_vm15 = vcmp.ge.f32.partialorder %v1535_v34, 0.0 }
 0x310   : > { %2402 = vmatmul.mubr.bf16.gmra.mrb[56].mxu1 %v2021_v20  ;;  %v1385_v60 = vpop.permute.xlu0 %1384 }
 0x311   : > { %v1457_v15 = vadd.f32 %v1385_v60, %v4058_v54  ;;  %3068 = vmatprep.mubr.msk.bf16.mxu1 %vm766_vm2, %v1906_v30  ;;  %v1643_v11 = vsel %vm1571_vm15, %v1535_v34, %v1607_v53 }
 0x312   : > { %v1655_v41 = vmul.f32 0.0, %v1643_v11 }
 0x313   : > { %v1493_v28 = vadd.f32 %v1457_v15, %v4184_v14 }
 0x314   : > { %v1958_v61 = vpop.permute.xlu1 %1957 }
 0x315   : > { %v1536_v17 = vadd.f32 %v4033_v2, %v1493_v28  ;;  %v2025_v54 = vsel %vm766_vm2, %v1834_v50, %v1958_v61 }
 0x317   : > { %v1608_v35 = vmul.f32 0.2, %v1536_v17  ;;  %vm1572_vm0 = vcmp.ge.f32.partialorder %v1536_v17, 0.0 }
 0x318   : > { %2412 = vmatmul.mubr.bf16.gmra.mrb[60].mxu1 %v2025_v54 }
 0x319   : > { %3069 = vmatprep.mubr.msk.bf16.mxu1 %vm766_vm2, %v1907_v45  ;;  %v1644_v14 = vsel %vm1572_vm0, %v1536_v17, %v1608_v35  ;;  %v4516_v17 = vld [vmem:[%s4862_s6] ss:$0 sm:$0xff] }
 0x31a   : > { %v1656_v23 = vmul.f32 0.0, %v1644_v14 }
 0x31c   : > { %v1960_v2 = vpop.permute.xlu0 %1959  ;;  %v1674_v19 = vpack.c.bf16 %v1656_v23, %v1655_v41 }
 0x31d   : > { %v2029_v13 = vsel %vm766_vm2, %v1835_v5, %v1960_v2  ;;  %v3211_v5 = vld [vmem:[%s3451_s21] sm:$0xff] }
 0x31e   : > { %1961 = vrot.lane.b32.xlu1 %v1674_v19, %s3323_s8  ;;  %v1798_v44 = vshll.u32 %v1674_v19, 16  ;;  %v1795_v6 = vshrl.u32 %v1674_v19, 16 }
 0x320   : > { %2422 = vmatmul.mubr.bf16.gmra.mrb[64].mxu1 %v2029_v13  ;;  %v1871_v26 = vrot.slane %v1798_v44, 1  ;;  %v1797_v36 = vrot.slane %v1795_v6, 7 }
 0x322   : > { %v1872_v18 = vor.u32 %v1871_v26, %v1795_v6  ;;  %v1800_v57 = vor.u32 %v1798_v44, %v1797_v36 }
 0x324   : > { %v1908_v1 = vsel %vm3533_vm3, %v1872_v18, 0  ;;  %v1836_v53 = vsel %vm3622_vm6, 0, %v1800_v57 }
 0x325   : > { %3070 = vmatprep.mubr.msk.bf16.mxu1 %vm766_vm2, %v1908_v1  ;;  %v3212_v1 = vld [vmem:[%s3451_s21 + $0x8] sm:$0xff] }
 0x339   : > { %v2267_v62 = vpop.f32.mrb[0].mxu1 }
 0x33a   : > { %v2269_v38 = vpop.f32.mrb[1].mxu1 }
 0x33b   : > { %v2270_v3 = vpop.f32.mrb[2].mxu1 }
 0x33c   : > { %v2272_v63 = vpop.f32.mrb[3].mxu1 }
 0x341   : > { %v4422_v7 = vpop.f32.mrb[4].mxu1 }
 0x342   : > { %v2277_v59 = vpop.f32.mrb[5].mxu1  ;;  %2472 = vrot.lane.b32.xlu0 %v4422_v7, %s3323_s8 }
 0x343   : > { %v4426_v37 = vpop.f32.mrb[6].mxu1 }
 0x344   : > { %v2280_v10 = vpop.f32.mrb[7].mxu1  ;;  %2474 = vrot.lane.b32.xlu1 %v4426_v37, %s3323_s8 }
 0x349   : > { %v4430_v52 = vpop.f32.mrb[8].mxu1 }
 0x34a   : > { %v2285_v0 = vpop.f32.mrb[9].mxu1  ;;  %2476 = vrot.lane.b32.xlu0 %v4430_v52, %s3323_s8 }
 0x34b   : > { %v4434_v8 = vpop.f32.mrb[10].mxu1 }
 0x34c   : > { %v2289_v16 = vpop.f32.mrb[11].mxu1  ;;  %2478 = vrot.lane.b32.xlu1 %v4434_v8, %s3323_s8 }
 0x351   : > { %v4438_v58 = vpop.f32.mrb[12].mxu1 }
 0x352   : > { %v4440_v25 = vpop.f32.mrb[13].mxu1  ;;  %2480 = vrot.lane.b32.xlu0 %v4438_v58, %s3323_s8 }
 0x353   : > { %v4444_v56 = vpop.f32.mrb[14].mxu1 }
 0x354   : > { %v4446_v29 = vpop.f32.mrb[15].mxu1  ;;  %2482 = vrot.lane.b32.xlu1 %v4444_v56, %s3323_s8 }
 0x359   : > { %v4450_v46 = vpop.f32.mrb[16].mxu1 }
 0x35a   : > { %v4452_v9 = vpop.f32.mrb[17].mxu1  ;;  %2484 = vrot.lane.b32.xlu0 %v4450_v46, %s3323_s8 }
 0x35b   : > { %v4456_v40 = vpop.f32.mrb[18].mxu1 }
 0x35c   : > { %v4458_v27 = vpop.f32.mrb[19].mxu1  ;;  %2486 = vrot.lane.b32.xlu1 %v4456_v40, %s3323_s8 }
 0x361   : > { %v4462_v24 = vpop.f32.mrb[20].mxu1 }
 0x362   : > { %v4464_v48 = vpop.f32.mrb[21].mxu1  ;;  %2488 = vrot.lane.b32.xlu0 %v4462_v24, %s3323_s8 }
 0x363   : > { %v4468_v33 = vpop.f32.mrb[22].mxu1 }
 0x364   : > { %v4470_v39 = vpop.f32.mrb[23].mxu1  ;;  %2490 = vrot.lane.b32.xlu1 %v4468_v33, %s3323_s8 }
 0x369   : > { %v4474_v4 = vpop.f32.mrb[24].mxu1 }
 0x36a   : > { %v4476_v55 = vpop.f32.mrb[25].mxu1  ;;  %2492 = vrot.lane.b32.xlu0 %v4474_v4, %s3323_s8 }
 0x36b   : > { %v4480_v49 = vpop.f32.mrb[26].mxu1 }
 0x36c   : > { %v4482_v47 = vpop.f32.mrb[27].mxu1  ;;  %2494 = vrot.lane.b32.xlu1 %v4480_v49, %s3323_s8 }
 0x371   : > { %v4486_v22 = vpop.f32.mrb[28].mxu1 }
 0x372   : > { %v4488_v34 = vpop.f32.mrb[29].mxu1  ;;  %2496 = vrot.lane.b32.xlu0 %v4486_v22, %s3323_s8 }
 0x373   : > { %v4492_v20 = vpop.f32.mrb[30].mxu1 }
 0x374   : > { %v4494_v60 = vpop.f32.mrb[31].mxu1  ;;  %2498 = vrot.lane.b32.xlu1 %v4492_v20, %s3323_s8 }
 0x379   : > { %v4498_v30 = vpop.f32.mrb[32].mxu1 }
 0x37a   : > { %v4500_v43 = vpop.f32.mrb[33].mxu1  ;;  %2500 = vrot.lane.b32.xlu0 %v4498_v30, %s3323_s8 }
 0x37b   : > { %v4504_v15 = vpop.f32.mrb[34].mxu1 }
 0x37c   : > { %v4506_v12 = vpop.f32.mrb[35].mxu1  ;;  %2502 = vrot.lane.b32.xlu1 %v4504_v15, %s3323_s8 }
 0x390   : > { %v1962_v31 = vpop.permute.xlu1 %1961 }
 0x391   : > { %v2033_v28 = vsel %vm766_vm2, %v1836_v53, %v1962_v31  ;;  %v3213_v31 = vld [vmem:[%s3451_s21 + $0x10] sm:$0xff] }
 0x392   : > { %2432 = vmatmul.mubr.bf16.gmra.mrb[68].mxu1 %v2033_v28 }
 0x3b4   : > { %v2473_v61 = vpop.permute.xlu0 %2472 }
 0x3b5   : > { %v2568_v32 = vadd.f32 %v2473_v61, %v2267_v62 }
 0x3b6   : > { %v2475_v50 = vpop.permute.xlu1 %2474 }
 0x3b7   : > { %v2600_v51 = vadd.f32 %v2568_v32, %v2285_v0  ;;  %v2569_v35 = vadd.f32 %v2475_v50, %v2270_v3 }
 0x3b9   : > { %v2639_v54 = vadd.f32 %v4516_v17, %v2600_v51  ;;  %v2601_v11 = vadd.f32 %v2569_v35, %v2289_v16  ;;  %v3214_v35 = vld [vmem:[%s3451_s21 + $0x18] sm:$0xff] }
 0x3bb   : > { %vm2671_vm3 = vcmp.ge.f32.partialorder %v2639_v54, 0.0  ;;  %v2703_v21 = vmul.f32 0.2, %v2639_v54  ;;  %v2640_v45 = vadd.f32 %v4516_v17, %v2601_v11  ;;  %v4523_v14 = vpop.f32.mrb[36].mxu1 }
 0x3bc   : > { %v4525_v41 = vpop.f32.mrb[37].mxu1  ;;  %2504 = vrot.lane.b32.xlu0 %v4523_v14, %s3323_s8  ;;  %v2477_v23 = vpop.permute.xlu0 %2476 }
 0x3bd   : > { %v2735_v42 = vsel %vm2671_vm3, %v2639_v54, %v2703_v21  ;;  %vm2672_vm6 = vcmp.ge.f32.partialorder %v2640_v45, 0.0  ;;  %v2704_v2 = vmul.f32 0.2, %v2640_v45  ;;  %v2570_v19 = vadd.f32 %v2477_v23, %v4422_v7  ;;  %v4530_v44 = vpop.f32.mrb[38].mxu1 }
 0x3be   : > { %v2767_v6 = vadd.f32 %v3211_v5, %v2735_v42  ;;  %v4533_v13 = vpop.f32.mrb[39].mxu1  ;;  %2506 = vrot.lane.b32.xlu1 %v4530_v44, %s3323_s8  ;;  %v2479_v26 = vpop.permute.xlu1 %2478  ;;  %v3215_v5 = vld [vmem:[%s3451_s21 + $0x20] sm:$0xff] }
 0x3bf   : > { %v2736_v36 = vsel %vm2672_vm6, %v2640_v45, %v2704_v2  ;;  %v2602_v18 = vadd.f32 %v2570_v19, %v4440_v25  ;;  %v2571_v57 = vadd.f32 %v2479_v26, %v4426_v37 }
 0x3c0   : > { %2799 = vst.msk [vmem:[%s4539_s12] sm:$0xff] %vm766_vm2, %v2767_v6  ;;  %v2768_v62 = vadd.f32 %v3212_v1, %v2736_v36 }
 0x3c1   : > { %v2641_v38 = vadd.f32 %v4516_v17, %v2602_v18  ;;  %v2603_v3 = vadd.f32 %v2571_v57, %v4446_v29 }
 0x3c2   : > { %2800 = vst.msk [vmem:[%s4539_s12 + $0x8] sm:$0xff] %vm766_vm2, %v2768_v62  ;;  %v3216_v62 = vld [vmem:[%s3451_s21 + $0x28] sm:$0xff] }
 0x3c3   : > { %vm2673_vm1 = vcmp.ge.f32.partialorder %v2641_v38, 0.0  ;;  %v2705_v63 = vmul.f32 0.2, %v2641_v38  ;;  %v2642_v7 = vadd.f32 %v4516_v17, %v2603_v3  ;;  %v4549_v59 = vpop.f32.mrb[40].mxu1 }
 0x3c4   : > { %v4551_v37 = vpop.f32.mrb[41].mxu1  ;;  %2508 = vrot.lane.b32.xlu0 %v4549_v59, %s3323_s8  ;;  %v2481_v10 = vpop.permute.xlu0 %2480 }
 0x3c5   : > { %v2737_v0 = vsel %vm2673_vm1, %v2641_v38, %v2705_v63  ;;  %vm2674_vm4 = vcmp.ge.f32.partialorder %v2642_v7, 0.0  ;;  %v2706_v16 = vmul.f32 0.2, %v2642_v7  ;;  %v2572_v25 = vadd.f32 %v2481_v10, %v4430_v52  ;;  %v4556_v29 = vpop.f32.mrb[42].mxu1 }
 0x3c6   : > { %v2769_v53 = vadd.f32 %v3213_v31, %v2737_v0  ;;  %v4559_v28 = vpop.f32.mrb[43].mxu1  ;;  %2510 = vrot.lane.b32.xlu1 %v4556_v29, %s3323_s8  ;;  %v2483_v61 = vpop.permute.xlu1 %2482  ;;  %v3217_v31 = vld [vmem:[%s3451_s21 + $0x30] sm:$0xff] }
 0x3c7   : > { %v2738_v32 = vsel %vm2674_vm4, %v2642_v7, %v2706_v16  ;;  %v2604_v50 = vadd.f32 %v2572_v25, %v4452_v9  ;;  %v2573_v51 = vadd.f32 %v2483_v61, %v4434_v8 }
 0x3c8   : > { %2801 = vst.msk [vmem:[%s4539_s12 + $0x10] sm:$0xff] %vm766_vm2, %v2769_v53  ;;  %v2770_v54 = vadd.f32 %v3214_v35, %v2738_v32 }
 0x3c9   : > { %v2643_v52 = vadd.f32 %v4516_v17, %v2604_v50  ;;  %v2605_v11 = vadd.f32 %v2573_v51, %v4458_v27 }
 0x3ca   : > { %2802 = vst.msk [vmem:[%s4539_s12 + $0x18] sm:$0xff] %vm766_vm2, %v2770_v54  ;;  %v3218_v54 = vld [vmem:[%s3451_s21 + $0x38] sm:$0xff] }
 0x3cb   : > { %vm2675_vm5 = vcmp.ge.f32.partialorder %v2643_v52, 0.0  ;;  %v2707_v21 = vmul.f32 0.2, %v2643_v52  ;;  %v2644_v45 = vadd.f32 %v4516_v17, %v2605_v11  ;;  %v4573_v23 = vpop.f32.mrb[44].mxu1 }
 0x3cc   : > { %v4575_v9 = vpop.f32.mrb[45].mxu1  ;;  %2512 = vrot.lane.b32.xlu0 %v4573_v23, %s3323_s8  ;;  %v2485_v8 = vpop.permute.xlu0 %2484 }
 0x3cd   : > { %v2739_v42 = vsel %vm2675_vm5, %v2643_v52, %v2707_v21  ;;  %vm2676_vm7 = vcmp.ge.f32.partialorder %v2644_v45, 0.0  ;;  %v2708_v2 = vmul.f32 0.2, %v2644_v45  ;;  %v2574_v27 = vadd.f32 %v2485_v8, %v4438_v58  ;;  %v4580_v19 = vpop.f32.mrb[46].mxu1 }
 0x3ce   : > { %v2771_v6 = vadd.f32 %v3215_v5, %v2739_v42  ;;  %v4583_v26 = vpop.f32.mrb[47].mxu1  ;;  %2514 = vrot.lane.b32.xlu1 %v4580_v19, %s3323_s8  ;;  %v2487_v36 = vpop.permute.xlu1 %2486  ;;  %v3219_v5 = vld [vmem:[%s3451_s21 + $0x40] sm:$0xff] }
 0x3cf   : > { %v2740_v18 = vsel %vm2676_vm7, %v2644_v45, %v2708_v2  ;;  %v2606_v57 = vadd.f32 %v2574_v27, %v4464_v48  ;;  %v2575_v1 = vadd.f32 %v2487_v36, %v4444_v56 }
 0x3d0   : > { %2803 = vst.msk [vmem:[%s4539_s12 + $0x20] sm:$0xff] %vm766_vm2, %v2771_v6  ;;  %v2772_v38 = vadd.f32 %v3216_v62, %v2740_v18 }
 0x3d1   : > { %v2645_v58 = vadd.f32 %v4516_v17, %v2606_v57  ;;  %v2607_v3 = vadd.f32 %v2575_v1, %v4470_v39 }
 0x3d2   : > { %2804 = vst.msk [vmem:[%s4539_s12 + $0x28] sm:$0xff] %vm766_vm2, %v2772_v38  ;;  %v3220_v38 = vld [vmem:[%s3451_s21 + $0x48] sm:$0xff] }
 0x3d3   : > { %vm2677_vm8 = vcmp.ge.f32.partialorder %v2645_v58, 0.0  ;;  %v2709_v63 = vmul.f32 0.2, %v2645_v58  ;;  %v2646_v7 = vadd.f32 %v4516_v17, %v2607_v3  ;;  %v4597_v10 = vpop.f32.mrb[48].mxu1 }
 0x3d4   : > { %v4599_v48 = vpop.f32.mrb[49].mxu1  ;;  %2516 = vrot.lane.b32.xlu0 %v4597_v10, %s3323_s8  ;;  %v2489_v56 = vpop.permute.xlu0 %2488 }
 0x3d5   : > { %v2741_v0 = vsel %vm2677_vm8, %v2645_v58, %v2709_v63  ;;  %vm2678_vm9 = vcmp.ge.f32.partialorder %v2646_v7, 0.0  ;;  %v2710_v16 = vmul.f32 0.2, %v2646_v7  ;;  %v2576_v39 = vadd.f32 %v2489_v56, %v4450_v46  ;;  %v4604_v25 = vpop.f32.mrb[50].mxu1 }
 0x3d6   : > { %v2773_v53 = vadd.f32 %v3217_v31, %v2741_v0  ;;  %v4607_v61 = vpop.f32.mrb[51].mxu1  ;;  %2518 = vrot.lane.b32.xlu1 %v4604_v25, %s3323_s8  ;;  %v2491_v32 = vpop.permute.xlu1 %2490  ;;  %v3221_v31 = vld [vmem:[%s3451_s21 + $0x50] sm:$0xff] }
 0x3d7   : > { %v2742_v50 = vsel %vm2678_vm9, %v2646_v7, %v2710_v16  ;;  %v2608_v51 = vadd.f32 %v2576_v39, %v4476_v55  ;;  %v2577_v35 = vadd.f32 %v2491_v32, %v4456_v40 }
 0x3d8   : > { %2805 = vst.msk [vmem:[%s4539_s12 + $0x30] sm:$0xff] %vm766_vm2, %v2773_v53  ;;  %v2774_v52 = vadd.f32 %v3218_v54, %v2742_v50 }
 0x3d9   : > { %v2647_v46 = vadd.f32 %v4516_v17, %v2608_v51  ;;  %v2609_v11 = vadd.f32 %v2577_v35, %v4482_v47 }
 0x3da   : > { %2806 = vst.msk [vmem:[%s4539_s12 + $0x38] sm:$0xff] %vm766_vm2, %v2774_v52  ;;  %v3222_v52 = vld [vmem:[%s3451_s21 + $0x58] sm:$0xff] }
 0x3db   : > { %vm2679_vm10 = vcmp.ge.f32.partialorder %v2647_v46, 0.0  ;;  %v2711_v21 = vmul.f32 0.2, %v2647_v46  ;;  %v2648_v45 = vadd.f32 %v4516_v17, %v2609_v11  ;;  %v4621_v8 = vpop.f32.mrb[52].mxu1 }
 0x3dc   : > { %v4623_v55 = vpop.f32.mrb[53].mxu1  ;;  %2520 = vrot.lane.b32.xlu0 %v4621_v8, %s3323_s8  ;;  %v2493_v40 = vpop.permute.xlu0 %2492 }
 0x3dd   : > { %v2743_v42 = vsel %vm2679_vm10, %v2647_v46, %v2711_v21  ;;  %vm2680_vm11 = vcmp.ge.f32.partialorder %v2648_v45, 0.0  ;;  %v2712_v2 = vmul.f32 0.2, %v2648_v45  ;;  %v2578_v47 = vadd.f32 %v2493_v40, %v4462_v24  ;;  %v4628_v27 = vpop.f32.mrb[54].mxu1 }
 0x3de   : > { %v2775_v6 = vadd.f32 %v3219_v5, %v2743_v42  ;;  %v4631_v36 = vpop.f32.mrb[55].mxu1  ;;  %2522 = vrot.lane.b32.xlu1 %v4628_v27, %s3323_s8  ;;  %v2495_v18 = vpop.permute.xlu1 %2494  ;;  %v3223_v5 = vld [vmem:[%s3451_s21 + $0x60] sm:$0xff] }
 0x3df   : > { %v2744_v57 = vsel %vm2680_vm11, %v2648_v45, %v2712_v2  ;;  %v2610_v1 = vadd.f32 %v2578_v47, %v4488_v34  ;;  %v2579_v62 = vadd.f32 %v2495_v18, %v4468_v33 }
 0x3e0   : > { %2807 = vst.msk [vmem:[%s4539_s12 + $0x40] sm:$0xff] %vm766_vm2, %v2775_v6  ;;  %v2776_v58 = vadd.f32 %v3220_v38, %v2744_v57 }
 0x3e1   : > { %v2649_v24 = vadd.f32 %v4516_v17, %v2610_v1  ;;  %v2611_v3 = vadd.f32 %v2579_v62, %v4494_v60 }
 0x3e2   : > { %2808 = vst.msk [vmem:[%s4539_s12 + $0x48] sm:$0xff] %vm766_vm2, %v2776_v58  ;;  %v3224_v58 = vld [vmem:[%s3451_s21 + $0x68] sm:$0xff] }
 0x3e3   : > { %vm2681_vm12 = vcmp.ge.f32.partialorder %v2649_v24, 0.0  ;;  %v2713_v63 = vmul.f32 0.2, %v2649_v24  ;;  %v2650_v7 = vadd.f32 %v4516_v17, %v2611_v3  ;;  %v4645_v56 = vpop.f32.mrb[56].mxu1 }
 0x3e4   : > { %v4647_v34 = vpop.f32.mrb[57].mxu1  ;;  %2524 = vrot.lane.b32.xlu0 %v4645_v56, %s3323_s8  ;;  %v2497_v33 = vpop.permute.xlu0 %2496 }
 0x3e5   : > { %v2745_v0 = vsel %vm2681_vm12, %v2649_v24, %v2713_v63  ;;  %vm2682_vm13 = vcmp.ge.f32.partialorder %v2650_v7, 0.0  ;;  %v2714_v16 = vmul.f32 0.2, %v2650_v7  ;;  %v2580_v60 = vadd.f32 %v2497_v33, %v4474_v4  ;;  %v4652_v39 = vpop.f32.mrb[58].mxu1 }
 0x3e6   : > { %v2777_v53 = vadd.f32 %v3221_v31, %v2745_v0  ;;  %v4655_v32 = vpop.f32.mrb[59].mxu1  ;;  %2526 = vrot.lane.b32.xlu1 %v4652_v39, %s3323_s8  ;;  %v2499_v50 = vpop.permute.xlu1 %2498 }
 0x3e7   : > { %v2746_v51 = vsel %vm2682_vm13, %v2650_v7, %v2714_v16  ;;  %v2612_v35 = vadd.f32 %v2580_v60, %v4500_v43  ;;  %v2581_v54 = vadd.f32 %v2499_v50, %v4480_v49  ;;  %v3225_v60 = vld [vmem:[%s3451_s21 + $0x70] sm:$0xff]  ;;  %v3226_v50 = vld [vmem:[%s3451_s21 + $0x78] sm:$0xff] }
 0x3e8   : > { %2809 = vst.msk [vmem:[%s4539_s12 + $0x50] sm:$0xff] %vm766_vm2, %v2777_v53  ;;  %v2778_v46 = vadd.f32 %v3222_v52, %v2746_v51 }
 0x3e9   : > { %v2651_v4 = vadd.f32 %v4516_v17, %v2612_v35  ;;  %v2613_v11 = vadd.f32 %v2581_v54, %v4506_v12 }
 0x3ea   : > { %2810 = vst.msk [vmem:[%s4539_s12 + $0x58] sm:$0xff] %vm766_vm2, %v2778_v46 }
 0x3eb   : > { %vm2683_vm14 = vcmp.ge.f32.partialorder %v2651_v4, 0.0  ;;  %v2715_v21 = vmul.f32 0.2, %v2651_v4  ;;  %v2652_v45 = vadd.f32 %v4516_v17, %v2613_v11  ;;  %v4669_v40 = vpop.f32.mrb[60].mxu1 }
 0x3ec   : > { %v4671_v43 = vpop.f32.mrb[61].mxu1  ;;  %2528 = vrot.lane.b32.xlu0 %v4669_v40, %s3323_s8  ;;  %v2501_v49 = vpop.permute.xlu0 %2500 }
 0x3ed   : > { %v2747_v42 = vsel %vm2683_vm14, %v2651_v4, %v2715_v21  ;;  %vm2684_vm15 = vcmp.ge.f32.partialorder %v2652_v45, 0.0  ;;  %v2716_v2 = vmul.f32 0.2, %v2652_v45  ;;  %v2582_v12 = vadd.f32 %v2501_v49, %v4486_v22  ;;  %v4676_v47 = vpop.f32.mrb[62].mxu1 }
 0x3ee   : > { %v2779_v6 = vadd.f32 %v3223_v5, %v2747_v42  ;;  %v4679_v18 = vpop.f32.mrb[63].mxu1  ;;  %2530 = vrot.lane.b32.xlu1 %v4676_v47, %s3323_s8  ;;  %v2503_v57 = vpop.permute.xlu1 %2502 }
 0x3ef   : > { %v2748_v1 = vsel %vm2684_vm15, %v2652_v45, %v2716_v2  ;;  %v2614_v62 = vadd.f32 %v2582_v12, %v4525_v41  ;;  %v2583_v38 = vadd.f32 %v2503_v57, %v4492_v20 }
 0x3f0   : > { %2811 = vst.msk [vmem:[%s4539_s12 + $0x60] sm:$0xff] %vm766_vm2, %v2779_v6  ;;  %v2780_v22 = vadd.f32 %v3224_v58, %v2748_v1  ;;  %v3228_v1 = vld [vmem:[%s3451_s21 + $0x88] sm:$0xff] }
 0x3f1   : > { %v2653_v24 = vadd.f32 %v4516_v17, %v2614_v62  ;;  %v2615_v3 = vadd.f32 %v2583_v38, %v4533_v13 }
 0x3f2   : > { %2812 = vst.msk [vmem:[%s4539_s12 + $0x68] sm:$0xff] %vm766_vm2, %v2780_v22 }
 0x3f3   : > { %vm2685_vm0 = vcmp.ge.f32.partialorder %v2653_v24, 0.0  ;;  %v2717_v63 = vmul.f32 0.2, %v2653_v24  ;;  %v2654_v7 = vadd.f32 %v4516_v17, %v2615_v3  ;;  %v2423_v41 = vpop.f32.mrb[64].mxu1 }
 0x3f4   : > { %2532 = vrot.lane.b32.xlu0 %v2423_v41, %s3323_s8  ;;  %v4694_v20 = vpop.f32.mrb[65].mxu1 }
 0x3f5   : > { %v2749_v33 = vsel %vm2685_vm0, %v2653_v24, %v2717_v63  ;;  %vm2686_vm3 = vcmp.ge.f32.partialorder %v2654_v7, 0.0  ;;  %v2718_v0 = vmul.f32 0.2, %v2654_v7  ;;  %v2427_v16 = vpop.f32.mrb[66].mxu1  ;;  %v3229_v63 = vld [vmem:[%s3451_s21 + $0x90] sm:$0xff] }
 0x3f6   : > { %v2781_v13 = vadd.f32 %v3225_v60, %v2749_v33  ;;  %v4697_v31 = vpop.f32.mrb[67].mxu1  ;;  %2534 = vrot.lane.b32.xlu1 %v2427_v16, %s3323_s8  ;;  %v3230_v16 = vld [vmem:[%s3451_s21 + $0x98] sm:$0xff]  ;;  %s3080_s8 = sshll.u32 %s3313_s27, 12  ;;  %s4810_s27 = scalar_lea.sflag [#allocation3], %s346_s23 }
 0x3f7   : > { %v2750_v53 = vsel %vm2686_vm3, %v2654_v7, %v2718_v0  ;;  %s4799_s18 = scalar_lea.hbm %s4863_s7, %s3080_s8 }
 0x3f8   : > { %2813 = vst.msk [vmem:[%s4539_s12 + $0x70] sm:$0xff] %vm766_vm2, %v2781_v13  ;;  %v2782_v51 = vadd.f32 %v3226_v50, %v2750_v53 }
 0x3fa   : > { %2814 = vst.msk [vmem:[%s4539_s12 + $0x78] sm:$0xff] %vm766_vm2, %v2782_v51 }
 0x42e   : > { %v2505_v35 = vpop.permute.xlu0 %2504 }
 0x42f   : > { %v2584_v54 = vadd.f32 %v2505_v35, %v4498_v30 }
 0x430   : > { %v2507_v52 = vpop.permute.xlu1 %2506 }
 0x431   : > { %v2616_v46 = vadd.f32 %v2584_v54, %v4551_v37  ;;  %v2585_v4 = vadd.f32 %v2507_v52, %v4504_v15  ;;  %v3227_v37 = vld [vmem:[%s3451_s21 + $0x80] sm:$0xff] }
 0x432   : > { %v3231_v54 = vld [vmem:[%s3451_s21 + $0xa0] sm:$0xff] }
 0x433   : > { %v2655_v11 = vadd.f32 %v4516_v17, %v2616_v46  ;;  %v2617_v21 = vadd.f32 %v2585_v4, %v4559_v28 }
 0x435   : > { %vm2687_vm6 = vcmp.ge.f32.partialorder %v2655_v11, 0.0  ;;  %v2719_v45 = vmul.f32 0.2, %v2655_v11  ;;  %v2656_v49 = vadd.f32 %v4516_v17, %v2617_v21  ;;  %v3232_v21 = vld [vmem:[%s3451_s21 + $0xa8] sm:$0xff] }
 0x436   : > { %v2509_v42 = vpop.permute.xlu0 %2508 }
 0x437   : > { %v2751_v2 = vsel %vm2687_vm6, %v2655_v11, %v2719_v45  ;;  %vm2688_vm1 = vcmp.ge.f32.partialorder %v2656_v49, 0.0  ;;  %v2720_v30 = vmul.f32 0.2, %v2656_v49  ;;  %v2586_v12 = vadd.f32 %v2509_v42, %v4523_v14 }
 0x438   : > { %v2783_v5 = vadd.f32 %v3227_v37, %v2751_v2  ;;  %v2511_v15 = vpop.permute.xlu1 %2510  ;;  %v3233_v37 = vld [vmem:[%s3451_s21 + $0xb0] sm:$0xff] }
 0x439   : > { %v2752_v6 = vsel %vm2688_vm1, %v2656_v49, %v2720_v30  ;;  %v2618_v57 = vadd.f32 %v2586_v12, %v4575_v9  ;;  %v2587_v28 = vadd.f32 %v2511_v15, %v4530_v44 }
 0x43a   : > { %2815 = vst.msk [vmem:[%s4539_s12 + $0x80] sm:$0xff] %vm766_vm2, %v2783_v5  ;;  %v2784_v62 = vadd.f32 %v3228_v1, %v2752_v6 }
 0x43b   : > { %v2657_v38 = vadd.f32 %v4516_v17, %v2618_v57  ;;  %v2619_v58 = vadd.f32 %v2587_v28, %v4583_v26  ;;  %v3234_v28 = vld [vmem:[%s3451_s21 + $0xb8] sm:$0xff] }
 0x43c   : > { %2816 = vst.msk [vmem:[%s4539_s12 + $0x88] sm:$0xff] %vm766_vm2, %v2784_v62 }
 0x43d   : > { %vm2689_vm4 = vcmp.ge.f32.partialorder %v2657_v38, 0.0  ;;  %v2721_v14 = vmul.f32 0.2, %v2657_v38  ;;  %v2658_v22 = vadd.f32 %v4516_v17, %v2619_v58 }
 0x43e   : > { %v2513_v9 = vpop.permute.xlu0 %2512 }
 0x43f   : > { %v2753_v24 = vsel %vm2689_vm4, %v2657_v38, %v2721_v14  ;;  %vm2690_vm5 = vcmp.ge.f32.partialorder %v2658_v22, 0.0  ;;  %v2722_v44 = vmul.f32 0.2, %v2658_v22  ;;  %v2588_v3 = vadd.f32 %v2513_v9, %v4549_v59  ;;  %v3235_v9 = vld [vmem:[%s3451_s21 + $0xc0] sm:$0xff] }
 0x440   : > { %v2785_v7 = vadd.f32 %v3229_v63, %v2753_v24  ;;  %v2515_v41 = vpop.permute.xlu1 %2514 }
 0x441   : > { %v2754_v33 = vsel %vm2690_vm5, %v2658_v22, %v2722_v44  ;;  %v2620_v26 = vadd.f32 %v2588_v3, %v4599_v48  ;;  %v2589_v0 = vadd.f32 %v2515_v41, %v4556_v29 }
 0x442   : > { %2817 = vst.msk [vmem:[%s4539_s12 + $0x90] sm:$0xff] %vm766_vm2, %v2785_v7  ;;  %v2786_v60 = vadd.f32 %v3230_v16, %v2754_v33  ;;  %v3236_v7 = vld [vmem:[%s3451_s21 + $0xc8] sm:$0xff] }
 0x443   : > { %v2659_v13 = vadd.f32 %v4516_v17, %v2620_v26  ;;  %v2621_v53 = vadd.f32 %v2589_v0, %v4607_v61 }
 0x444   : > { %2818 = vst.msk [vmem:[%s4539_s12 + $0x98] sm:$0xff] %vm766_vm2, %v2786_v60 }
 0x445   : > { %vm2691_vm7 = vcmp.ge.f32.partialorder %v2659_v13, 0.0  ;;  %v2723_v59 = vmul.f32 0.2, %v2659_v13  ;;  %v2660_v50 = vadd.f32 %v4516_v17, %v2621_v53 }
 0x446   : > { %v2517_v48 = vpop.permute.xlu0 %2516 }
 0x447   : > { %v2755_v51 = vsel %vm2691_vm7, %v2659_v13, %v2723_v59  ;;  %vm2692_vm8 = vcmp.ge.f32.partialorder %v2660_v50, 0.0  ;;  %v2724_v29 = vmul.f32 0.2, %v2660_v50  ;;  %v2590_v35 = vadd.f32 %v2517_v48, %v4573_v23  ;;  %v3237_v13 = vld [vmem:[%s3451_s21 + $0xd0] sm:$0xff] }
 0x448   : > { %v2787_v52 = vadd.f32 %v3231_v54, %v2755_v51  ;;  %v2519_v46 = vpop.permute.xlu1 %2518  ;;  %v3238_v51 = vld [vmem:[%s3451_s21 + $0xd8] sm:$0xff] }
 0x449   : > { %v2756_v4 = vsel %vm2692_vm8, %v2660_v50, %v2724_v29  ;;  %v2622_v61 = vadd.f32 %v2590_v35, %v4623_v55  ;;  %v2591_v11 = vadd.f32 %v2519_v46, %v4580_v19 }
 0x44a   : > { %2819 = vst.msk [vmem:[%s4539_s12 + $0xa0] sm:$0xff] %vm766_vm2, %v2787_v52  ;;  %v2788_v45 = vadd.f32 %v3232_v21, %v2756_v4 }
 0x44b   : > { %v2661_v49 = vadd.f32 %v4516_v17, %v2622_v61  ;;  %v2623_v42 = vadd.f32 %v2591_v11, %v4631_v36 }
 0x44c   : > { %2820 = vst.msk [vmem:[%s4539_s12 + $0xa8] sm:$0xff] %vm766_vm2, %v2788_v45  ;;  %v3239_v45 = vld [vmem:[%s3451_s21 + $0xe0] sm:$0xff] }
 0x44d   : > { %vm2693_vm9 = vcmp.ge.f32.partialorder %v2661_v49, 0.0  ;;  %v2725_v23 = vmul.f32 0.2, %v2661_v49  ;;  %v2662_v2 = vadd.f32 %v4516_v17, %v2623_v42 }
 0x44e   : > { %v2521_v55 = vpop.permute.xlu0 %2520 }
 0x44f   : > { %v2757_v30 = vsel %vm2693_vm9, %v2661_v49, %v2725_v23  ;;  %vm2694_vm10 = vcmp.ge.f32.partialorder %v2662_v2, 0.0  ;;  %v2726_v19 = vmul.f32 0.2, %v2662_v2  ;;  %v2592_v12 = vadd.f32 %v2521_v55, %v4597_v10 }
 0x450   : > { %v2789_v5 = vadd.f32 %v3233_v37, %v2757_v30  ;;  %v2523_v15 = vpop.permute.xlu1 %2522  ;;  %v3240_v30 = vld [vmem:[%s3451_s21 + $0xe8] sm:$0xff] }
 0x451   : > { %v2758_v6 = vsel %vm2694_vm10, %v2662_v2, %v2726_v19  ;;  %v2624_v36 = vadd.f32 %v2592_v12, %v4647_v34  ;;  %v2593_v57 = vadd.f32 %v2523_v15, %v4604_v25 }
 0x452   : > { %2821 = vst.msk [vmem:[%s4539_s12 + $0xb0] sm:$0xff] %vm766_vm2, %v2789_v5  ;;  %v2790_v1 = vadd.f32 %v3234_v28, %v2758_v6  ;;  %v3241_v6 = vld [vmem:[%s3451_s21 + $0xf0] sm:$0xff] }
 0x453   : > { %v2663_v62 = vadd.f32 %v4516_v17, %v2624_v36  ;;  %v2625_v38 = vadd.f32 %v2593_v57, %v4655_v32 }
 0x454   : > { %2822 = vst.msk [vmem:[%s4539_s12 + $0xb8] sm:$0xff] %vm766_vm2, %v2790_v1 }
 0x455   : > { %vm2695_vm11 = vcmp.ge.f32.partialorder %v2663_v62, 0.0  ;;  %v2727_v10 = vmul.f32 0.2, %v2663_v62  ;;  %v2664_v58 = vadd.f32 %v4516_v17, %v2625_v38 }
 0x456   : > { %v2525_v34 = vpop.permute.xlu0 %2524 }
 0x457   : > { %v2759_v14 = vsel %vm2695_vm11, %v2663_v62, %v2727_v10  ;;  %vm2696_vm12 = vcmp.ge.f32.partialorder %v2664_v58, 0.0  ;;  %v2728_v25 = vmul.f32 0.2, %v2664_v58  ;;  %v2594_v22 = vadd.f32 %v2525_v34, %v4621_v8 }
 0x458   : > { %v2791_v24 = vadd.f32 %v3235_v9, %v2759_v14  ;;  %v2527_v44 = vpop.permute.xlu1 %2526 }
 0x459   : > { %v2760_v3 = vsel %vm2696_vm12, %v2664_v58, %v2728_v25  ;;  %v2626_v32 = vadd.f32 %v2594_v22, %v4671_v43  ;;  %v2595_v63 = vadd.f32 %v2527_v44, %v4628_v27 }
 0x45a   : > { %2823 = vst.msk [vmem:[%s4539_s12 + $0xc0] sm:$0xff] %vm766_vm2, %v2791_v24  ;;  %v2792_v41 = vadd.f32 %v3236_v7, %v2760_v3 }
 0x45b   : > { %v2665_v33 = vadd.f32 %v4516_v17, %v2626_v32  ;;  %v2627_v26 = vadd.f32 %v2595_v63, %v4679_v18 }
 0x45c   : > { %2824 = vst.msk [vmem:[%s4539_s12 + $0xc8] sm:$0xff] %vm766_vm2, %v2792_v41 }
 0x45d   : > { %vm2697_vm13 = vcmp.ge.f32.partialorder %v2665_v33, 0.0  ;;  %v2729_v8 = vmul.f32 0.2, %v2665_v33  ;;  %v2666_v0 = vadd.f32 %v4516_v17, %v2627_v26 }
 0x45e   : > { %v2529_v43 = vpop.permute.xlu0 %2528 }
 0x45f   : > { %v2761_v16 = vsel %vm2697_vm13, %v2665_v33, %v2729_v8  ;;  %vm2698_vm14 = vcmp.ge.f32.partialorder %v2666_v0, 0.0  ;;  %v2730_v27 = vmul.f32 0.2, %v2666_v0  ;;  %v2596_v60 = vadd.f32 %v2529_v43, %v4645_v56 }
 0x460   : > { %v2793_v53 = vadd.f32 %v3237_v13, %v2761_v16  ;;  %v2531_v59 = vpop.permute.xlu1 %2530 }
 0x461   : > { %v2762_v50 = vsel %vm2698_vm14, %v2666_v0, %v2730_v27  ;;  %v2628_v18 = vadd.f32 %v2596_v60, %v4694_v20  ;;  %v2597_v48 = vadd.f32 %v2531_v59, %v4652_v39 }
 0x462   : > { %2825 = vst.msk [vmem:[%s4539_s12 + $0xd0] sm:$0xff] %vm766_vm2, %v2793_v53  ;;  %v2794_v29 = vadd.f32 %v3238_v51, %v2762_v50 }
 0x463   : > { %v2667_v35 = vadd.f32 %v4516_v17, %v2628_v18  ;;  %v2629_v54 = vadd.f32 %v2597_v48, %v4697_v31 }
 0x464   : > { %2826 = vst.msk [vmem:[%s4539_s12 + $0xd8] sm:$0xff] %vm766_vm2, %v2794_v29 }
 0x465   : > { %vm2699_vm15 = vcmp.ge.f32.partialorder %v2667_v35, 0.0  ;;  %v2731_v56 = vmul.f32 0.2, %v2667_v35  ;;  %v2668_v52 = vadd.f32 %v4516_v17, %v2629_v54  ;;  %v2433_v46 = vpop.f32.mrb[68].mxu1 }
 0x466   : > { %v2533_v20 = vpop.permute.xlu0 %2532  ;;  %v2434_v39 = vpop.f32.mrb[69].mxu1 }
 0x467   : > { %v2763_v4 = vsel %vm2699_vm15, %v2667_v35, %v2731_v56  ;;  %vm2700_vm0 = vcmp.ge.f32.partialorder %v2668_v52, 0.0  ;;  %v2732_v61 = vmul.f32 0.2, %v2668_v52  ;;  %v2598_v11 = vadd.f32 %v2533_v20, %v4669_v40  ;;  %v2436_v21 = vpop.f32.mrb[70].mxu1 }
 0x468   : > { %v2795_v31 = vadd.f32 %v3239_v45, %v2763_v4  ;;  %v2535_v49 = vpop.permute.xlu1 %2534  ;;  %v2437_v42 = vpop.f32.mrb[71].mxu1 }
 0x469   : > { %v2764_v23 = vsel %vm2700_vm0, %v2668_v52, %v2732_v61  ;;  %v2630_v2 = vadd.f32 %v2598_v11, %v2434_v39  ;;  %v2599_v55 = vadd.f32 %v2535_v49, %v4676_v47 }
 0x46a   : > { %2827 = vst.msk [vmem:[%s4539_s12 + $0xe0] sm:$0xff] %vm766_vm2, %v2795_v31  ;;  %v2796_v19 = vadd.f32 %v3240_v30, %v2764_v23 }
 0x46b   : > { %v2669_v12 = vadd.f32 %v4516_v17, %v2630_v2  ;;  %v2631_v40 = vadd.f32 %v2599_v55, %v2437_v42 }
 0x46c   : > { %2828 = vst.msk [vmem:[%s4539_s12 + $0xe8] sm:$0xff] %vm766_vm2, %v2796_v19 }
 0x46d   : > { %vm2701_vm3 = vcmp.ge.f32.partialorder %v2669_v12, 0.0  ;;  %v2733_v37 = vmul.f32 0.2, %v2669_v12  ;;  %v2670_v5 = vadd.f32 %v4516_v17, %v2631_v40  ;;  %v3242_v17 = vld [vmem:[%s3451_s21 + $0xf8] sm:$0xff] }
 0x46f   : > { %v2765_v47 = vsel %vm2701_vm3, %v2669_v12, %v2733_v37  ;;  %vm2702_vm6 = vcmp.ge.f32.partialorder %v2670_v5, 0.0  ;;  %v2734_v15 = vmul.f32 0.2, %v2670_v5 }
 0x470   : > { %v2797_v36 = vadd.f32 %v3241_v6, %v2765_v47 }
 0x471   : > { %v2766_v57 = vsel %vm2702_vm6, %v2670_v5, %v2734_v15 }
 0x472   : > { %2829 = vst.msk [vmem:[%s4539_s12 + $0xf0] sm:$0xff] %vm766_vm2, %v2797_v36  ;;  %v2798_v28 = vadd.f32 %v3242_v17, %v2766_v57 }
 0x474   : > { %2830 = vst.msk [vmem:[%s4539_s12 + $0xf8] sm:$0xff] %vm766_vm2, %v2798_v28 }
 0x475   : > { %3256 = shalt.err (!%p3253_p5)
}
 0x476   : > { %s3257_s21 = scalar_lea.hbm %s4799_s18, 4096  ;;  %s3261_s10 = scalar_lea.hbm %s4863_s7, 8192 }
 0x477   : > { %p3258_p6 = scmp.ne.s32.totalorder %s4799_s18, %s3257_s21  ;;  %p3262_p10 = scmp.lt.u32.totalorder %s4799_s18, %s4863_s7 }
 0x478   : > { %p3263_p11 = scmp.lt.u32.totalorder %s3261_s10, %s3257_s21  ;;  %p3265_p13 = scmp.lt.u32.totalorder %s3257_s21, %s4799_s18 }
 0x479   : > { %p3259_p7 = pnand %p3258_p6, %p3407_p4 }
 0x47a   : > { %p3264_p12 = por %p3263_p11, %p3262_p10 }
 0x47b   : > { %p3260_p9 = pneg %p3259_p7 }
 0x47c   : > { %p3266_p0 = por %p3265_p13, %p3264_p12 }
 0x47e   : > { %p3267_p1 = pnand %p3266_p0, %p3260_p9 }
 0x480   : > { %3270 = shalt.err (!%p3267_p1)
}
 0x481   : > { %s3325_s16 = smov 128   ;;  %s3326_s17 = smov 8  }
 0x482   : > { %3081 = dma.vmem_to_hbm [thread:$0]  (%p3407_p4), %s4801_s15, 4096, %s4799_s18, %s4810_s27, %s3325_s16, %s3325_s16, %s3326_s17  }
 0x483 PF: > { %p3087_p2 = scmp.ge.s32.totalorder %s3321_s29, 2  ;;  %s2863_s20 = sand.u32 1, %s3301_s24  }
 0x484   : > { %s2864_s19 = scalar_lea.sflag [#allocation3], %s2863_s20 }
 0x485   : > { %p3084_p3 = pnand %p3087_p2, %p3414_p8 }
 0x487   : > { %3296 = dma.done.wait (!%p3084_p3), %s2864_s19, 4096  }
 0x488   : > { %3298 = vsyncadd (!%p3084_p3), %s2864_s19, 4294963200  ;;  %s20_s29 = sadd.s32 1, %s3321_s29   ;;  %s4911_s11 = sld [smem:[#allocation5_spill]] }
 0x489   : > { %p17_p5 = scmp.ge.s32.totalorder %s20_s29, 4   ;;  %s4912_s24 = smov %s3305_s25 }
 0x48a   : > { %s4913_s25 = smov %s3309_s26  ;;  %s4914_s26 = smov %s3420_s14 }
 0x48b   : > { %s4915_s27 = smov %s3317_s28  ;;  %19 = sbr.rel (!%p17_p5) target bundleno = 4 (0x4), region = 89 }
 0x48e   : > { %s4916_s28 = smov %s4911_s11 }
 0x492   :  { %2869 = vsyncpa [#allocation3], 1 }
 0x493   :  { %2871 = vsyncpa [#allocation3 + $0x1], 1 }

</bundles_post_ra>
